<compile_context>
chip_gen: v7x
topology: tpu7x:2x2x1
jax: 0.10.0
libtpu: 0.0.40
codegen_flags: <defaults>
</compile_context>

<pallas_src>
import jax
import jax.numpy as jnp
from jax import lax
from jax.experimental import pallas as pl
from jax.experimental.pallas import tpu as pltpu


# --------------------------------------------------------------------------- #
# Kernels
# --------------------------------------------------------------------------- #
def conv_relu_pool_kernel(p_ref, w_ref, o_ref):
    """Fused conv-as-GEMM + bias + relu + 2x2 max-pool.

    p_ref: [4, M, Kp]  im2col patches; leading axis = 4 taps of each pool window;
                       one column holds 1.0 (bias), remaining columns are zero pad.
    w_ref: [Kp, N]     weights with the bias folded in as a matching row.
    o_ref: [M, N]      pooled, relu'd conv output (M = B * pooled_H * pooled_W).
    """
    w = w_ref[...]
    acc = None
    for s in range(4):  # static unroll over the 2x2 pool window
        y = jnp.maximum(
            jnp.dot(p_ref[s], w, preferred_element_type=jnp.float32), 0.0)
        acc = y if acc is None else jnp.maximum(acc, y)
    o_ref[...] = acc


def fc_head_kernel(x_ref, w1_ref, w2_ref, logits_ref, h_ref):
    """Fused fc1 + tanh (+ inference-mode dropout) + fc2.

    x_ref:  [B, 808]    flattened features; col 800 == 1.0 (bias), rest zero pad.
    w1_ref: [808, 128]  fc1 weights, row 800 = fc1 bias.
    w2_ref: [129, 128]  fc2 weights zero-padded to 128 output lanes; row 128 = bias.
    Outputs: logits_ref [B, 128] (only first 10 lanes meaningful), h_ref [B, 128].
    """
    h = jnp.tanh(jnp.dot(x_ref[...], w1_ref[...],
                         preferred_element_type=jnp.float32))
    h_ref[...] = h
    # Dropout(0.3) is the identity at inference.
    # TODO(synk): training-mode dropout would need pltpu.prng_seed + prng_random_bits.
    w2 = w2_ref[0:128, :]
    b2 = w2_ref[128:129, :]
    logits_ref[...] = jnp.dot(h, w2, preferred_element_type=jnp.float32) + b2


# --------------------------------------------------------------------------- #
# pallas_call wrappers
# --------------------------------------------------------------------------- #
def _full_spec(shape):
    n = len(shape)
    return pl.BlockSpec(shape, lambda i, _n=n: (0,) * _n)


def _conv_relu_pool(patches, wslab, n_out):
    _, m, _ = patches.shape
    return pl.pallas_call(
        conv_relu_pool_kernel,
        out_shape=jax.ShapeDtypeStruct((m, n_out), jnp.float32),
        grid_spec=pltpu.PrefetchScalarGridSpec(
            num_scalar_prefetch=0,
            grid=(1,),
            in_specs=[_full_spec(patches.shape), _full_spec(wslab.shape)],
            out_specs=pl.BlockSpec((m, n_out), lambda i: (0, 0)),
        ),
        compiler_params=pltpu.CompilerParams(
            dimension_semantics=("arbitrary",)),
    )(patches, wslab)


def _fc_head(x_aug, w1slab, w2slab):
    b = x_aug.shape[0]
    return pl.pallas_call(
        fc_head_kernel,
        out_shape=(jax.ShapeDtypeStruct((b, 128), jnp.float32),
                   jax.ShapeDtypeStruct((b, 128), jnp.float32)),
        grid_spec=pltpu.PrefetchScalarGridSpec(
            num_scalar_prefetch=0,
            grid=(1,),
            in_specs=[_full_spec(x_aug.shape),
                      _full_spec(w1slab.shape),
                      _full_spec(w2slab.shape)],
            out_specs=[pl.BlockSpec((b, 128), lambda i: (0, 0)),
                       pl.BlockSpec((b, 128), lambda i: (0, 0))],
        ),
        compiler_params=pltpu.CompilerParams(
            dimension_semantics=("arbitrary",)),
    )(x_aug, w1slab, w2slab)


# --------------------------------------------------------------------------- #
# Wrapper-side data plumbing (cheap jnp reshapes; all inside jit)
# --------------------------------------------------------------------------- #
def _append_ones_and_pad(p, kp):
    """Append a constant-1 column (for the folded bias) and zero-pad K to `kp`."""
    ones = jnp.ones(p.shape[:-1] + (1,), p.dtype)
    zeros = jnp.zeros(p.shape[:-1] + (kp - p.shape[-1] - 1,), p.dtype)
    return jnp.concatenate([p, ones, zeros], axis=-1)


def _conv_patches_pooled(x_nhwc, ksize, out_hw, pool_hw):
    """im2col patches for a VALID `ksize`x`ksize` stride-1 conv, grouped by the
    2x2 max-pool window of the conv output.
    x_nhwc: [B, H, W, C]  ->  [4, B*pool_hw*pool_hw, ksize*ksize*C]
    """
    b = x_nhwc.shape[0]
    c = x_nhwc.shape[-1]
    cols = [x_nhwc[:, dy:dy + out_hw, dx:dx + out_hw, :]
            for dy in range(ksize) for dx in range(ksize)]
    p = jnp.concatenate(cols, axis=-1)                       # [B, out, out, k*k*C]
    p = p.reshape(b, pool_hw, 2, pool_hw, 2, ksize * ksize * c)
    p = p.transpose(2, 4, 0, 1, 3, 5)                        # [2, 2, B, ph, pw, K]
    return p.reshape(4, b * pool_hw * pool_hw, ksize * ksize * c)


def net_mnist_forward(x_nchw, prep):
    """x_nchw: [B,1,28,28] f32.  Returns (logits [B,10], h [B,128])."""
    wb1, wb2, w1slab, w2slab = prep
    b = x_nchw.shape[0]

    # conv1 + relu + 2x2 pool : [B,1,28,28] -> [B,12,12,20]
    p1 = _conv_patches_pooled(jnp.transpose(x_nchw, (0, 2, 3, 1)),
                              ksize=5, out_hw=24, pool_hw=12)
    p1 = _append_ones_and_pad(p1, 32)
    y1 = _conv_relu_pool(p1, wb1, n_out=20).reshape(b, 12, 12, 20)

    # conv2 + relu + 2x2 pool : [B,12,12,20] -> [B*16, 50] (== [B,4,4,50])
    p2 = _conv_patches_pooled(y1, ksize=5, out_hw=8, pool_hw=4)
    p2 = _append_ones_and_pad(p2, 512)
    y2 = _conv_relu_pool(p2, wb2, n_out=50)

    # flatten (NHWC order; fc1 weights were re-ordered to match) + fused FC head
    x_flat = _append_ones_and_pad(y2.reshape(b, 800), 808)
    logits_pad, h = _fc_head(x_flat, w1slab, w2slab)
    return logits_pad[:, :10], h


# --------------------------------------------------------------------------- #
# One-time parameter packing (outside the hot path)
# --------------------------------------------------------------------------- #
def prepare_params(params):
    (w1, b1), (w2, b2), (wf1, bf1), (wf2, bf2) = params
    f32 = jnp.float32

    # conv1 [20,1,5,5] -> [25,20]; bias row at 25; zero-pad K to 32.
    w1g = w1.reshape(20, 25).T
    wb1 = jnp.concatenate(
        [w1g, b1[None, :], jnp.zeros((32 - 26, 20), f32)], axis=0)

    # conv2 [50,20,5,5] -> (dy, dx, cin, cout) = [500,50]; bias row at 500; pad K to 512.
    w2g = jnp.transpose(w2, (2, 3, 1, 0)).reshape(500, 50)
    wb2 = jnp.concatenate(
        [w2g, b2[None, :], jnp.zeros((512 - 501, 50), f32)], axis=0)

    # fc1 [128,800]: reorder input features from torch's (c,h,w) flatten to the
    # kernel's NHWC (h,w,c) flatten, transpose to [800,128], bias row at 800.
    wf1r = jnp.transpose(wf1.reshape(128, 50, 4, 4),
                         (0, 2, 3, 1)).reshape(128, 800).T
    w1slab = jnp.concatenate(
        [wf1r, bf1[None, :], jnp.zeros((808 - 801, 128), f32)], axis=0)

    # fc2 [10,128] -> [128,128] with zero-padded output lanes (lane-dense store);
    # bias row at 128.
    wf2p = jnp.zeros((128, 128), f32).at[:, :10].set(wf2.T)
    bf2p = jnp.zeros((1, 128), f32).at[0, :10].set(bf2)
    w2slab = jnp.concatenate([wf2p, bf2p], axis=0)

    return wb1, wb2, w1slab, w2slab


# --------------------------------------------------------------------------- #
# Parameter init + pure-JAX reference (mirrors the PyTorch forward)
# --------------------------------------------------------------------------- #
def init_params(key):
    def layer(k, fan_in, shape_w, shape_b):
        kw, kb = jax.random.split(k)
        bound = 1.0 / jnp.sqrt(jnp.float32(fan_in))
        w = jax.random.uniform(kw, shape_w, jnp.float32, -bound, bound)
        b = jax.random.uniform(kb, shape_b, jnp.float32, -bound, bound)
        return w, b

    k1, k2, k3, k4 = jax.random.split(key, 4)
    conv1 = layer(k1, 1 * 5 * 5, (20, 1, 5, 5), (20,))
    conv2 = layer(k2, 20 * 5 * 5, (50, 20, 5, 5), (50,))
    fc1 = layer(k3, 800, (128, 800), (128,))
    fc2 = layer(k4, 128, (10, 128), (10,))
    return conv1, conv2, fc1, fc2


def reference(x, params):
    (w1, b1), (w2, b2), (wf1, bf1), (wf2, bf2) = params
    dn = ('NCHW', 'OIHW', 'NCHW')
    hp = jax.lax.Precision.HIGHEST

    y = lax.conv_general_dilated(x, w1, (1, 1), 'VALID',
                                 dimension_numbers=dn, precision=hp)
    y = jnp.maximum(y + b1[None, :, None, None], 0.0)
    y = y.reshape(y.shape[0], y.shape[1], 12, 2, 12, 2).max(axis=(3, 5))

    y = lax.conv_general_dilated(y, w2, (1, 1), 'VALID',
                                 dimension_numbers=dn, precision=hp)
    y = jnp.maximum(y + b2[None, :, None, None], 0.0)
    y = y.reshape(y.shape[0], y.shape[1], 4, 2, 4, 2).max(axis=(3, 5))

    y = y.reshape(y.shape[0], -1)                       # torch .view(-1, 800)
    h = jnp.tanh(jnp.dot(y, wf1.T, precision=hp) + bf1)
    logits = jnp.dot(h, wf2.T, precision=hp) + bf2      # dropout == identity (eval)
    return logits, h


if __name__ == "__main__":
    key = jax.random.PRNGKey(0)
    kx, kp = jax.random.split(key)

    B = 2
    x = jax.random.normal(kx, (B, 1, 28, 28), jnp.float32)
    params = init_params(kp)
    prep = prepare_params(params)           # one-time packing, outside the hot path

    fwd = jax.jit(net_mnist_forward)
    logits, h = fwd(x, prep)
    logits, h = jax.block_until_ready((logits, h))

    ref_logits, ref_h = reference(x, params)
    assert logits.shape == (B, 10) and h.shape == (B, 128)
    assert jnp.allclose(logits, ref_logits, atol=1e-4, rtol=1e-4), (logits, ref_logits)
    assert jnp.allclose(h, ref_h, atol=1e-4, rtol=1e-4), (h, ref_h)

    print("KERNEL_OK")
</pallas_src>

<mosaic_0001>
module attributes {stable_mosaic.version = 11 : i64} {
  func.func @conv_relu_pool_kernel(%arg0: i32, %arg1: memref<4x288x32xf32, #tpu.memory_space<vmem>>, %arg2: memref<32x20xf32, #tpu.memory_space<vmem>>, %arg3: memref<288x20xf32, #tpu.memory_space<vmem>>) attributes {dimension_semantics = [#tpu.dimension_semantics<arbitrary>], iteration_bounds = array<i64: 1>, scalar_prefetch = 0 : i64, scratch_operands = 0 : i64, tpu.core_type = #tpu.core_type<tc>, window_params = [{pipeline_mode = #tpu.pipeline_mode<synchronous>, transform_indices = @transform_0, window_bounds = array<i64: 4, 288, 32>}, {pipeline_mode = #tpu.pipeline_mode<synchronous>, transform_indices = @transform_1, window_bounds = array<i64: 32, 20>}, {pipeline_mode = #tpu.pipeline_mode<synchronous>, transform_indices = @transform_2, window_bounds = array<i64: 288, 20>}]} {
    %c0 = arith.constant 0 : index
    %c0_0 = arith.constant 0 : index
    %0 = vector.load %arg2[%c0, %c0_0] : memref<32x20xf32, #tpu.memory_space<vmem>>, vector<32x20xf32>
    %c0_1 = arith.constant 0 : index
    %c0_2 = arith.constant 0 : index
    %c0_3 = arith.constant 0 : index
    %1 = vector.load %arg1[%c0_1, %c0_2, %c0_3] : memref<4x288x32xf32, #tpu.memory_space<vmem>>, vector<1x288x32xf32>
    %2 = vector.shape_cast %1 : vector<1x288x32xf32> to vector<288x32xf32>
    %cst = arith.constant dense<0.000000e+00> : vector<288x20xf32>
    %3 = tpu.matmul %2, %0, %cst {dimension_numbers = #tpu.dot_dimension_numbers<[1], [0], [0], [1], [0, 0, 1, 1], [], []>} : vector<288x32xf32>, vector<32x20xf32>, vector<288x20xf32> -> vector<288x20xf32>
    %cst_4 = arith.constant 0.000000e+00 : f32
    %4 = vector.broadcast %cst_4 : f32 to vector<288x20xf32>
    %5 = arith.maximumf %3, %4 : vector<288x20xf32>
    %c1 = arith.constant 1 : index
    %c0_5 = arith.constant 0 : index
    %c0_6 = arith.constant 0 : index
    %6 = vector.load %arg1[%c1, %c0_5, %c0_6] : memref<4x288x32xf32, #tpu.memory_space<vmem>>, vector<1x288x32xf32>
    %7 = vector.shape_cast %6 : vector<1x288x32xf32> to vector<288x32xf32>
    %cst_7 = arith.constant dense<0.000000e+00> : vector<288x20xf32>
    %8 = tpu.matmul %7, %0, %cst_7 {dimension_numbers = #tpu.dot_dimension_numbers<[1], [0], [0], [1], [0, 0, 1, 1], [], []>} : vector<288x32xf32>, vector<32x20xf32>, vector<288x20xf32> -> vector<288x20xf32>
    %cst_8 = arith.constant 0.000000e+00 : f32
    %9 = vector.broadcast %cst_8 : f32 to vector<288x20xf32>
    %10 = arith.maximumf %8, %9 : vector<288x20xf32>
    %11 = arith.maximumf %5, %10 : vector<288x20xf32>
    %c2 = arith.constant 2 : index
    %c0_9 = arith.constant 0 : index
    %c0_10 = arith.constant 0 : index
    %12 = vector.load %arg1[%c2, %c0_9, %c0_10] : memref<4x288x32xf32, #tpu.memory_space<vmem>>, vector<1x288x32xf32>
    %13 = vector.shape_cast %12 : vector<1x288x32xf32> to vector<288x32xf32>
    %cst_11 = arith.constant dense<0.000000e+00> : vector<288x20xf32>
    %14 = tpu.matmul %13, %0, %cst_11 {dimension_numbers = #tpu.dot_dimension_numbers<[1], [0], [0], [1], [0, 0, 1, 1], [], []>} : vector<288x32xf32>, vector<32x20xf32>, vector<288x20xf32> -> vector<288x20xf32>
    %cst_12 = arith.constant 0.000000e+00 : f32
    %15 = vector.broadcast %cst_12 : f32 to vector<288x20xf32>
    %16 = arith.maximumf %14, %15 : vector<288x20xf32>
    %17 = arith.maximumf %11, %16 : vector<288x20xf32>
    %c3 = arith.constant 3 : index
    %c0_13 = arith.constant 0 : index
    %c0_14 = arith.constant 0 : index
    %18 = vector.load %arg1[%c3, %c0_13, %c0_14] : memref<4x288x32xf32, #tpu.memory_space<vmem>>, vector<1x288x32xf32>
    %19 = vector.shape_cast %18 : vector<1x288x32xf32> to vector<288x32xf32>
    %cst_15 = arith.constant dense<0.000000e+00> : vector<288x20xf32>
    %20 = tpu.matmul %19, %0, %cst_15 {dimension_numbers = #tpu.dot_dimension_numbers<[1], [0], [0], [1], [0, 0, 1, 1], [], []>} : vector<288x32xf32>, vector<32x20xf32>, vector<288x20xf32> -> vector<288x20xf32>
    %cst_16 = arith.constant 0.000000e+00 : f32
    %21 = vector.broadcast %cst_16 : f32 to vector<288x20xf32>
    %22 = arith.maximumf %20, %21 : vector<288x20xf32>
    %23 = arith.maximumf %17, %22 : vector<288x20xf32>
    %c0_17 = arith.constant 0 : index
    %c0_18 = arith.constant 0 : index
    %24 = vector.load %arg3[%c0_17, %c0_18] : memref<288x20xf32, #tpu.memory_space<vmem>>, vector<288x20xf32>
    tpu.vector_store %arg3[%c0_17, %c0_18], %23 {strides = array<i32>} : memref<288x20xf32, #tpu.memory_space<vmem>>, vector<288x20xf32>,
    return
  }
  func.func @transform_0(%arg0: i32) -> (i32, i32, i32) {
    %c0_i32 = arith.constant 0 : i32
    %c0_i32_0 = arith.constant 0 : i32
    %c0_i32_1 = arith.constant 0 : i32
    %c0_i32_2 = arith.constant 0 : i32
    return %c0_i32, %c0_i32_0, %c0_i32_1 : i32, i32, i32
  }
  func.func @transform_1(%arg0: i32) -> (i32, i32) {
    %c0_i32 = arith.constant 0 : i32
    %c0_i32_0 = arith.constant 0 : i32
    %c0_i32_1 = arith.constant 0 : i32
    return %c0_i32, %c0_i32_0 : i32, i32
  }
  func.func @transform_2(%arg0: i32) -> (i32, i32) {
    %c0_i32 = arith.constant 0 : i32
    %c0_i32_0 = arith.constant 0 : i32
    %c0_i32_1 = arith.constant 0 : i32
    return %c0_i32, %c0_i32_0 : i32, i32
  }
}

module attributes {stable_mosaic.version = 11 : i64} {
  func.func @conv_relu_pool_kernel(%arg0: i32, %arg1: memref<4x32x512xf32, #tpu.memory_space<vmem>>, %arg2: memref<512x50xf32, #tpu.memory_space<vmem>>, %arg3: memref<32x50xf32, #tpu.memory_space<vmem>>) attributes {dimension_semantics = [#tpu.dimension_semantics<arbitrary>], iteration_bounds = array<i64: 1>, scalar_prefetch = 0 : i64, scratch_operands = 0 : i64, tpu.core_type = #tpu.core_type<tc>, window_params = [{pipeline_mode = #tpu.pipeline_mode<synchronous>, transform_indices = @transform_0, window_bounds = array<i64: 4, 32, 512>}, {pipeline_mode = #tpu.pipeline_mode<synchronous>, transform_indices = @transform_1, window_bounds = array<i64: 512, 50>}, {pipeline_mode = #tpu.pipeline_mode<synchronous>, transform_indices = @transform_2, window_bounds = array<i64: 32, 50>}]} {
    %c0 = arith.constant 0 : index
    %c0_0 = arith.constant 0 : index
    %0 = vector.load %arg2[%c0, %c0_0] : memref<512x50xf32, #tpu.memory_space<vmem>>, vector<512x50xf32>
    %c0_1 = arith.constant 0 : index
    %c0_2 = arith.constant 0 : index
    %c0_3 = arith.constant 0 : index
    %1 = vector.load %arg1[%c0_1, %c0_2, %c0_3] : memref<4x32x512xf32, #tpu.memory_space<vmem>>, vector<1x32x512xf32>
    %2 = vector.shape_cast %1 : vector<1x32x512xf32> to vector<32x512xf32>
    %cst = arith.constant dense<0.000000e+00> : vector<32x50xf32>
    %3 = tpu.matmul %2, %0, %cst {dimension_numbers = #tpu.dot_dimension_numbers<[1], [0], [0], [1], [0, 0, 1, 1], [], []>} : vector<32x512xf32>, vector<512x50xf32>, vector<32x50xf32> -> vector<32x50xf32>
    %cst_4 = arith.constant 0.000000e+00 : f32
    %4 = vector.broadcast %cst_4 : f32 to vector<32x50xf32>
    %5 = arith.maximumf %3, %4 : vector<32x50xf32>
    %c1 = arith.constant 1 : index
    %c0_5 = arith.constant 0 : index
    %c0_6 = arith.constant 0 : index
    %6 = vector.load %arg1[%c1, %c0_5, %c0_6] : memref<4x32x512xf32, #tpu.memory_space<vmem>>, vector<1x32x512xf32>
    %7 = vector.shape_cast %6 : vector<1x32x512xf32> to vector<32x512xf32>
    %cst_7 = arith.constant dense<0.000000e+00> : vector<32x50xf32>
    %8 = tpu.matmul %7, %0, %cst_7 {dimension_numbers = #tpu.dot_dimension_numbers<[1], [0], [0], [1], [0, 0, 1, 1], [], []>} : vector<32x512xf32>, vector<512x50xf32>, vector<32x50xf32> -> vector<32x50xf32>
    %cst_8 = arith.constant 0.000000e+00 : f32
    %9 = vector.broadcast %cst_8 : f32 to vector<32x50xf32>
    %10 = arith.maximumf %8, %9 : vector<32x50xf32>
    %11 = arith.maximumf %5, %10 : vector<32x50xf32>
    %c2 = arith.constant 2 : index
    %c0_9 = arith.constant 0 : index
    %c0_10 = arith.constant 0 : index
    %12 = vector.load %arg1[%c2, %c0_9, %c0_10] : memref<4x32x512xf32, #tpu.memory_space<vmem>>, vector<1x32x512xf32>
    %13 = vector.shape_cast %12 : vector<1x32x512xf32> to vector<32x512xf32>
    %cst_11 = arith.constant dense<0.000000e+00> : vector<32x50xf32>
    %14 = tpu.matmul %13, %0, %cst_11 {dimension_numbers = #tpu.dot_dimension_numbers<[1], [0], [0], [1], [0, 0, 1, 1], [], []>} : vector<32x512xf32>, vector<512x50xf32>, vector<32x50xf32> -> vector<32x50xf32>
    %cst_12 = arith.constant 0.000000e+00 : f32
    %15 = vector.broadcast %cst_12 : f32 to vector<32x50xf32>
    %16 = arith.maximumf %14, %15 : vector<32x50xf32>
    %17 = arith.maximumf %11, %16 : vector<32x50xf32>
    %c3 = arith.constant 3 : index
    %c0_13 = arith.constant 0 : index
    %c0_14 = arith.constant 0 : index
    %18 = vector.load %arg1[%c3, %c0_13, %c0_14] : memref<4x32x512xf32, #tpu.memory_space<vmem>>, vector<1x32x512xf32>
    %19 = vector.shape_cast %18 : vector<1x32x512xf32> to vector<32x512xf32>
    %cst_15 = arith.constant dense<0.000000e+00> : vector<32x50xf32>
    %20 = tpu.matmul %19, %0, %cst_15 {dimension_numbers = #tpu.dot_dimension_numbers<[1], [0], [0], [1], [0, 0, 1, 1], [], []>} : vector<32x512xf32>, vector<512x50xf32>, vector<32x50xf32> -> vector<32x50xf32>
    %cst_16 = arith.constant 0.000000e+00 : f32
    %21 = vector.broadcast %cst_16 : f32 to vector<32x50xf32>
    %22 = arith.maximumf %20, %21 : vector<32x50xf32>
    %23 = arith.maximumf %17, %22 : vector<32x50xf32>
    %c0_17 = arith.constant 0 : index
    %c0_18 = arith.constant 0 : index
    %24 = vector.load %arg3[%c0_17, %c0_18] : memref<32x50xf32, #tpu.memory_space<vmem>>, vector<32x50xf32>
    tpu.vector_store %arg3[%c0_17, %c0_18], %23 {strides = array<i32>} : memref<32x50xf32, #tpu.memory_space<vmem>>, vector<32x50xf32>,
    return
  }
  func.func @transform_0(%arg0: i32) -> (i32, i32, i32) {
    %c0_i32 = arith.constant 0 : i32
    %c0_i32_0 = arith.constant 0 : i32
    %c0_i32_1 = arith.constant 0 : i32
    %c0_i32_2 = arith.constant 0 : i32
    return %c0_i32, %c0_i32_0, %c0_i32_1 : i32, i32, i32
  }
  func.func @transform_1(%arg0: i32) -> (i32, i32) {
    %c0_i32 = arith.constant 0 : i32
    %c0_i32_0 = arith.constant 0 : i32
    %c0_i32_1 = arith.constant 0 : i32
    return %c0_i32, %c0_i32_0 : i32, i32
  }
  func.func @transform_2(%arg0: i32) -> (i32, i32) {
    %c0_i32 = arith.constant 0 : i32
    %c0_i32_0 = arith.constant 0 : i32
    %c0_i32_1 = arith.constant 0 : i32
    return %c0_i32, %c0_i32_0 : i32, i32
  }
}

module attributes {stable_mosaic.version = 11 : i64} {
  func.func @fc_head_kernel(%arg0: i32, %arg1: memref<2x808xf32, #tpu.memory_space<vmem>>, %arg2: memref<808x128xf32, #tpu.memory_space<vmem>>, %arg3: memref<129x128xf32, #tpu.memory_space<vmem>>, %arg4: memref<2x128xf32, #tpu.memory_space<vmem>>, %arg5: memref<2x128xf32, #tpu.memory_space<vmem>>) attributes {dimension_semantics = [#tpu.dimension_semantics<arbitrary>], iteration_bounds = array<i64: 1>, scalar_prefetch = 0 : i64, scratch_operands = 0 : i64, tpu.core_type = #tpu.core_type<tc>, window_params = [{pipeline_mode = #tpu.pipeline_mode<synchronous>, transform_indices = @transform_0, window_bounds = array<i64: 2, 808>}, {pipeline_mode = #tpu.pipeline_mode<synchronous>, transform_indices = @transform_1, window_bounds = array<i64: 808, 128>}, {pipeline_mode = #tpu.pipeline_mode<synchronous>, transform_indices = @transform_2, window_bounds = array<i64: 129, 128>}, {pipeline_mode = #tpu.pipeline_mode<synchronous>, transform_indices = @transform_3, window_bounds = array<i64: 2, 128>}, {pipeline_mode = #tpu.pipeline_mode<synchronous>, transform_indices = @transform_4, window_bounds = array<i64: 2, 128>}]} {
    %c0 = arith.constant 0 : index
    %c0_0 = arith.constant 0 : index
    %0 = vector.load %arg1[%c0, %c0_0] : memref<2x808xf32, #tpu.memory_space<vmem>>, vector<2x808xf32>
    %c0_1 = arith.constant 0 : index
    %c0_2 = arith.constant 0 : index
    %1 = vector.load %arg2[%c0_1, %c0_2] : memref<808x128xf32, #tpu.memory_space<vmem>>, vector<808x128xf32>
    %cst = arith.constant dense<0.000000e+00> : vector<2x128xf32>
    %2 = tpu.matmul %0, %1, %cst {dimension_numbers = #tpu.dot_dimension_numbers<[1], [0], [0], [1], [0, 0, 1, 1], [], []>} : vector<2x808xf32>, vector<808x128xf32>, vector<2x128xf32> -> vector<2x128xf32>
    %3 = math.tanh %2 : vector<2x128xf32>
    %c0_3 = arith.constant 0 : index
    %c0_4 = arith.constant 0 : index
    %4 = vector.load %arg5[%c0_3, %c0_4] : memref<2x128xf32, #tpu.memory_space<vmem>>, vector<2x128xf32>
    tpu.vector_store %arg5[%c0_3, %c0_4], %3 {strides = array<i32>} : memref<2x128xf32, #tpu.memory_space<vmem>>, vector<2x128xf32>,
    %c0_5 = arith.constant 0 : index
    %c0_6 = arith.constant 0 : index
    %5 = vector.load %arg3[%c0_5, %c0_6] : memref<129x128xf32, #tpu.memory_space<vmem>>, vector<128x128xf32>
    %c128 = arith.constant 128 : index
    %c0_7 = arith.constant 0 : index
    %6 = vector.load %arg3[%c128, %c0_7] : memref<129x128xf32, #tpu.memory_space<vmem>>, vector<1x128xf32>
    %cst_8 = arith.constant dense<0.000000e+00> : vector<2x128xf32>
    %7 = tpu.matmul %3, %5, %cst_8 {dimension_numbers = #tpu.dot_dimension_numbers<[1], [0], [0], [1], [0, 0, 1, 1], [], []>} : vector<2x128xf32>, vector<128x128xf32>, vector<2x128xf32> -> vector<2x128xf32>
    %8 = vector.broadcast %6 : vector<1x128xf32> to vector<2x128xf32>
    %9 = arith.addf %7, %8 : vector<2x128xf32>
    %c0_9 = arith.constant 0 : index
    %c0_10 = arith.constant 0 : index
    %10 = vector.load %arg4[%c0_9, %c0_10] : memref<2x128xf32, #tpu.memory_space<vmem>>, vector<2x128xf32>
    tpu.vector_store %arg4[%c0_9, %c0_10], %9 {strides = array<i32>} : memref<2x128xf32, #tpu.memory_space<vmem>>, vector<2x128xf32>,
    return
  }
  func.func @transform_0(%arg0: i32) -> (i32, i32) {
    %c0_i32 = arith.constant 0 : i32
    %c0_i32_0 = arith.constant 0 : i32
    %c0_i32_1 = arith.constant 0 : i32
    return %c0_i32, %c0_i32_0 : i32, i32
  }
  func.func @transform_1(%arg0: i32) -> (i32, i32) {
    %c0_i32 = arith.constant 0 : i32
    %c0_i32_0 = arith.constant 0 : i32
    %c0_i32_1 = arith.constant 0 : i32
    return %c0_i32, %c0_i32_0 : i32, i32
  }
  func.func @transform_2(%arg0: i32) -> (i32, i32) {
    %c0_i32 = arith.constant 0 : i32
    %c0_i32_0 = arith.constant 0 : i32
    %c0_i32_1 = arith.constant 0 : i32
    return %c0_i32, %c0_i32_0 : i32, i32
  }
  func.func @transform_3(%arg0: i32) -> (i32, i32) {
    %c0_i32 = arith.constant 0 : i32
    %c0_i32_0 = arith.constant 0 : i32
    %c0_i32_1 = arith.constant 0 : i32
    return %c0_i32, %c0_i32_0 : i32, i32
  }
  func.func @transform_4(%arg0: i32) -> (i32, i32) {
    %c0_i32 = arith.constant 0 : i32
    %c0_i32_0 = arith.constant 0 : i32
    %c0_i32_1 = arith.constant 0 : i32
    return %c0_i32, %c0_i32_0 : i32, i32
  }
}

</mosaic_0001>

<bundles_post_ra>
// kernel: net_mnist_forward.3
= control target key start
LH: loop header
LB: loop body
LE: loop exit
PB: predicated region body
PF: predicated region fallthrough
CT: control target
= control target key end

     0   :  { %vm51_vm0 = vcmask 261120   ;;  %vm1827_vm1 = vcmask 162816   ;;  %s3415_s1 = inlined_call_operand.vmem [shape: f32[32,20], index: 1, kind: input, shape index: {}]   ;;  %s3416_s0 = inlined_call_operand.vmem [shape: f32[4,288,32], index: 0, kind: input, shape index: {}]   ;;  %s3417_s2 = inlined_call_operand.vmem [shape: f32[288,20], index: 2, kind: output, shape index: {}]  }
   0x1   :  { %v11_v0 = vld [vmem:[%s3415_s1] sm:$0xff]  ;;  %v12_v1 = vld [vmem:[%s3415_s1 + $0x8] sm:$0xff]  ;;  %v13_v2 = vld [vmem:[%s3415_s1 + $0x10] sm:$0xff] }
   0x2   :  { %v2528_v3 = vpack.c.bf16 %v12_v1, %v11_v0  ;;  %v14_v4 = vld [vmem:[%s3415_s1 + $0x18] sm:$0xff]  ;;  %v15_v5 = vld [vmem:[%s3416_s0] sm:$0xff]  ;;  %v16_v8 = vld [vmem:[%s3416_s0 + $0x8] sm:$0xff] }
   0x3   :  { %v1904_v6 = vld [vmem:[%s3416_s0 + $0x120] sm:$0xff]  ;;  %v2532_v7 = vpack.c.bf16 %v14_v4, %v13_v2  ;;  %2288 = vmatprep.mubr.msk.f32.mxu0 %vm51_vm0, %v15_v5  ;;  %v1905_v9 = vld [vmem:[%s3416_s0 + $0x128] sm:$0xff]  ;;  %v17_v10 = vld [vmem:[%s3416_s0 + $0x10] sm:$0xff] }
   0x4   :  { %2350 = vmatprep.mubr.msk.f32.mxu1 %vm51_vm0, %v1904_v6  ;;  %2529 = vmatprep.subr.bf16.mxu0 %v2528_v3  ;;  %v1906_v11 = vld [vmem:[%s3416_s0 + $0x130] sm:$0xff]  ;;  %v18_v12 = vld [vmem:[%s3416_s0 + $0x18] sm:$0xff]  ;;  %v19_v14 = vld [vmem:[%s3416_s0 + $0x20] sm:$0xff] }
   0x5   :  { %2537 = vmatprep.subr.bf16.mxu1 %v2528_v3  ;;  %2531 = vmatpush3.bf16.msra.mxu0 %v2528_v3  ;;  %v1907_v13 = vld [vmem:[%s3416_s0 + $0x138] sm:$0xff]  ;;  %v1908_v15 = vld [vmem:[%s3416_s0 + $0x140] sm:$0xff]  ;;  %v20_v16 = vld [vmem:[%s3416_s0 + $0x28] sm:$0xff] }
   0x6   :  { %2539 = vmatpush3.bf16.msra.mxu1 %v2528_v3  ;;  %2533 = vmatprep.subr.bf16.mxu0 %v2532_v7  ;;  %v1909_v17 = vld [vmem:[%s3416_s0 + $0x148] sm:$0xff]  ;;  %v21_v18 = vld [vmem:[%s3416_s0 + $0x30] sm:$0xff]  ;;  %v22_v20 = vld [vmem:[%s3416_s0 + $0x38] sm:$0xff] }
   0x7   :  { %2541 = vmatprep.subr.bf16.mxu1 %v2532_v7  ;;  %v1910_v19 = vld [vmem:[%s3416_s0 + $0x150] sm:$0xff]  ;;  %v1911_v21 = vld [vmem:[%s3416_s0 + $0x158] sm:$0xff]  ;;  %v23_v22 = vld [vmem:[%s3416_s0 + $0x40] sm:$0xff] }
   0x8   :  { %v1912_v23 = vld [vmem:[%s3416_s0 + $0x160] sm:$0xff]  ;;  %v24_v24 = vld [vmem:[%s3416_s0 + $0x48] sm:$0xff]  ;;  %v25_v26 = vld [vmem:[%s3416_s0 + $0x50] sm:$0xff] }
   0x9   :  { %2535 = vmatpush3.bf16.msra.mxu0 %v2532_v7  ;;  %v1913_v25 = vld [vmem:[%s3416_s0 + $0x168] sm:$0xff]  ;;  %v1914_v27 = vld [vmem:[%s3416_s0 + $0x170] sm:$0xff]  ;;  %v26_v28 = vld [vmem:[%s3416_s0 + $0x58] sm:$0xff] }
   0xa   :  { %2543 = vmatpush3.bf16.msra.mxu1 %v2532_v7  ;;  %2545 = vmatprep.subr.bf16.mxu0 %v2528_v3  ;;  %v1915_v29 = vld [vmem:[%s3416_s0 + $0x178] sm:$0xff]  ;;  %v27_v30 = vld [vmem:[%s3416_s0 + $0x60] sm:$0xff]  ;;  %v28_v32 = vld [vmem:[%s3416_s0 + $0x68] sm:$0xff] }
   0xb   :  { %2553 = vmatprep.subr.bf16.mxu1 %v2528_v3  ;;  %v1916_v31 = vld [vmem:[%s3416_s0 + $0x180] sm:$0xff]  ;;  %v1917_v33 = vld [vmem:[%s3416_s0 + $0x188] sm:$0xff]  ;;  %v29_v34 = vld [vmem:[%s3416_s0 + $0x70] sm:$0xff] }
   0xc   :  { %2289 = vmatmul.mubr.msk.f32.vlgmr.msra.gmra.mrb[0].mxu0 %vm51_vm0, %v16_v8  ;;  %v1918_v35 = vld [vmem:[%s3416_s0 + $0x190] sm:$0xff]  ;;  %v30_v36 = vld [vmem:[%s3416_s0 + $0x78] sm:$0xff]  ;;  %v31_v38 = vld [vmem:[%s3416_s0 + $0x80] sm:$0xff] }
   0xd   :  { %2351 = vmatmul.mubr.msk.f32.vlgmr.msra.gmra.mrb[0].mxu1 %vm51_vm0, %v1905_v9  ;;  %2547 = vmatpush3.bf16.msra.mxu0 %v2528_v3  ;;  %v1919_v37 = vld [vmem:[%s3416_s0 + $0x198] sm:$0xff]  ;;  %v1920_v39 = vld [vmem:[%s3416_s0 + $0x1a0] sm:$0xff]  ;;  %v32_v40 = vld [vmem:[%s3416_s0 + $0x88] sm:$0xff] }
   0xe   :  { %2291 = vmatprep.mubr.msk.f32.mxu0 %vm51_vm0, %v17_v10  ;;  %2353 = vmatprep.mubr.msk.f32.mxu1 %vm51_vm0, %v1906_v11  ;;  %v1921_v41 = vld [vmem:[%s3416_s0 + $0x1a8] sm:$0xff]  ;;  %v33_v42 = vld [vmem:[%s3416_s0 + $0x90] sm:$0xff]  ;;  %v34_v44 = vld [vmem:[%s3416_s0 + $0x98] sm:$0xff] }
   0xf   :  { %2555 = vmatpush3.bf16.msra.mxu1 %v2528_v3  ;;  %2549 = vmatprep.subr.bf16.mxu0 %v2532_v7  ;;  %v1922_v43 = vld [vmem:[%s3416_s0 + $0x1b0] sm:$0xff]  ;;  %v1923_v45 = vld [vmem:[%s3416_s0 + $0x1b8] sm:$0xff]  ;;  %v35_v46 = vld [vmem:[%s3416_s0 + $0xa0] sm:$0xff] }
  0x10   :  { %2557 = vmatprep.subr.bf16.mxu1 %v2532_v7  ;;  %2292 = vmatmul.mubr.msk.f32.gmra.mrb[2].mxu0 %vm51_vm0, %v18_v12  ;;  %v1924_v47 = vld [vmem:[%s3416_s0 + $0x1c0] sm:$0xff]  ;;  %v36_v48 = vld [vmem:[%s3416_s0 + $0xa8] sm:$0xff]  ;;  %v37_v50 = vld [vmem:[%s3416_s0 + $0xb0] sm:$0xff] }
  0x11   :  { %2354 = vmatmul.mubr.msk.f32.gmra.mrb[2].mxu1 %vm51_vm0, %v1907_v13  ;;  %2294 = vmatprep.mubr.msk.f32.mxu0 %vm51_vm0, %v19_v14  ;;  %v1925_v49 = vld [vmem:[%s3416_s0 + $0x1c8] sm:$0xff]  ;;  %v1926_v51 = vld [vmem:[%s3416_s0 + $0x1d0] sm:$0xff]  ;;  %v38_v52 = vld [vmem:[%s3416_s0 + $0xb8] sm:$0xff] }
  0x12   :  { %2356 = vmatprep.mubr.msk.f32.mxu1 %vm51_vm0, %v1908_v15  ;;  %2551 = vmatpush3.bf16.msra.mxu0 %v2532_v7  ;;  %v1927_v53 = vld [vmem:[%s3416_s0 + $0x1d8] sm:$0xff]  ;;  %v39_v54 = vld [vmem:[%s3416_s0 + $0xc0] sm:$0xff]  ;;  %v40_v56 = vld [vmem:[%s3416_s0 + $0xc8] sm:$0xff] }
  0x13   :  { %2559 = vmatpush3.bf16.msra.mxu1 %v2532_v7  ;;  %v1928_v55 = vld [vmem:[%s3416_s0 + $0x1e0] sm:$0xff]  ;;  %v1929_v57 = vld [vmem:[%s3416_s0 + $0x1e8] sm:$0xff]  ;;  %v41_v58 = vld [vmem:[%s3416_s0 + $0xd0] sm:$0xff] }
  0x14   :  { %2295 = vmatmul.mubr.msk.f32.gmra.mrb[4].mxu0 %vm51_vm0, %v20_v16  ;;  %v1930_v59 = vld [vmem:[%s3416_s0 + $0x1f0] sm:$0xff]  ;;  %v42_v60 = vld [vmem:[%s3416_s0 + $0xd8] sm:$0xff]  ;;  %v43_v62 = vld [vmem:[%s3416_s0 + $0xe0] sm:$0xff] }
  0x15   :  { %2357 = vmatmul.mubr.msk.f32.gmra.mrb[4].mxu1 %vm51_vm0, %v1909_v17  ;;  %2297 = vmatprep.mubr.msk.f32.mxu0 %vm51_vm0, %v21_v18  ;;  %v1931_v61 = vld [vmem:[%s3416_s0 + $0x1f8] sm:$0xff]  ;;  %v1932_v63 = vld [vmem:[%s3416_s0 + $0x200] sm:$0xff]  ;;  %v44_v0 = vld [vmem:[%s3416_s0 + $0xe8] sm:$0xff] }
  0x16   :  { %2359 = vmatprep.mubr.msk.f32.mxu1 %vm51_vm0, %v1910_v19  ;;  %v1933_v1 = vld [vmem:[%s3416_s0 + $0x208] sm:$0xff]  ;;  %v45_v2 = vld [vmem:[%s3416_s0 + $0xf0] sm:$0xff]  ;;  %v46_v4 = vld [vmem:[%s3416_s0 + $0xf8] sm:$0xff] }
  0x17   :  { %v1934_v3 = vld [vmem:[%s3416_s0 + $0x210] sm:$0xff]  ;;  %v1935_v5 = vld [vmem:[%s3416_s0 + $0x218] sm:$0xff]  ;;  %v47_v6 = vld [vmem:[%s3416_s0 + $0x100] sm:$0xff] }
  0x18   :  { %2298 = vmatmul.mubr.msk.f32.gmra.mrb[6].mxu0 %vm51_vm0, %v22_v20  ;;  %v1936_v7 = vld [vmem:[%s3416_s0 + $0x220] sm:$0xff]  ;;  %v48_v8 = vld [vmem:[%s3416_s0 + $0x108] sm:$0xff]  ;;  %v49_v10 = vld [vmem:[%s3416_s0 + $0x110] sm:$0xff] }
  0x19   :  { %2360 = vmatmul.mubr.msk.f32.gmra.mrb[6].mxu1 %vm51_vm0, %v1911_v21  ;;  %2300 = vmatprep.mubr.msk.f32.mxu0 %vm51_vm0, %v23_v22  ;;  %v1937_v9 = vld [vmem:[%s3416_s0 + $0x228] sm:$0xff]  ;;  %v1938_v11 = vld [vmem:[%s3416_s0 + $0x230] sm:$0xff]  ;;  %v50_v12 = vld [vmem:[%s3416_s0 + $0x118] sm:$0xff] }
  0x1a   :  { %2362 = vmatprep.mubr.msk.f32.mxu1 %vm51_vm0, %v1912_v23  ;;  %v1939_v13 = vld [vmem:[%s3416_s0 + $0x238] sm:$0xff]  ;;  %v1976_v14 = vld [vmem:[%s3416_s0 + $0x240] sm:$0xff]  ;;  %v1977_v16 = vld [vmem:[%s3416_s0 + $0x248] sm:$0xff] }
  0x1b   :  { %v2048_v15 = vld [vmem:[%s3416_s0 + $0x360] sm:$0xff]  ;;  %v2049_v17 = vld [vmem:[%s3416_s0 + $0x368] sm:$0xff]  ;;  %v1978_v18 = vld [vmem:[%s3416_s0 + $0x250] sm:$0xff] }
  0x1c   :  { %2301 = vmatmul.mubr.msk.f32.gmra.mrb[8].mxu0 %vm51_vm0, %v24_v24  ;;  %v2050_v19 = vld [vmem:[%s3416_s0 + $0x370] sm:$0xff]  ;;  %v1979_v20 = vld [vmem:[%s3416_s0 + $0x258] sm:$0xff]  ;;  %v1980_v22 = vld [vmem:[%s3416_s0 + $0x260] sm:$0xff] }
  0x1d   :  { %2363 = vmatmul.mubr.msk.f32.gmra.mrb[8].mxu1 %vm51_vm0, %v1913_v25  ;;  %2303 = vmatprep.mubr.msk.f32.mxu0 %vm51_vm0, %v25_v26  ;;  %v2051_v21 = vld [vmem:[%s3416_s0 + $0x378] sm:$0xff]  ;;  %v2052_v23 = vld [vmem:[%s3416_s0 + $0x380] sm:$0xff]  ;;  %v1981_v24 = vld [vmem:[%s3416_s0 + $0x268] sm:$0xff] }
  0x1e   :  { %2365 = vmatprep.mubr.msk.f32.mxu1 %vm51_vm0, %v1914_v27  ;;  %v2053_v25 = vld [vmem:[%s3416_s0 + $0x388] sm:$0xff]  ;;  %v1982_v26 = vld [vmem:[%s3416_s0 + $0x270] sm:$0xff] }
  0x1f   :  { %v2054_v27 = vld [vmem:[%s3416_s0 + $0x390] sm:$0xff] }
  0x20   :  { %2304 = vmatmul.mubr.msk.f32.gmra.mrb[10].mxu0 %vm51_vm0, %v26_v28  ;;  %v1983_v28 = vld [vmem:[%s3416_s0 + $0x278] sm:$0xff] }
  0x21   :  { %2366 = vmatmul.mubr.msk.f32.gmra.mrb[10].mxu1 %vm51_vm0, %v1915_v29  ;;  %2306 = vmatprep.mubr.msk.f32.mxu0 %vm51_vm0, %v27_v30  ;;  %v2055_v29 = vld [vmem:[%s3416_s0 + $0x398] sm:$0xff]  ;;  %v1984_v30 = vld [vmem:[%s3416_s0 + $0x280] sm:$0xff] }
  0x22   :  { %2368 = vmatprep.mubr.msk.f32.mxu1 %vm51_vm0, %v1916_v31  ;;  %v2056_v31 = vld [vmem:[%s3416_s0 + $0x3a0] sm:$0xff] }
  0x24   :  { %2307 = vmatmul.mubr.msk.f32.gmra.mrb[12].mxu0 %vm51_vm0, %v28_v32  ;;  %v1985_v32 = vld [vmem:[%s3416_s0 + $0x288] sm:$0xff] }
  0x25   :  { %2369 = vmatmul.mubr.msk.f32.gmra.mrb[12].mxu1 %vm51_vm0, %v1917_v33  ;;  %2309 = vmatprep.mubr.msk.f32.mxu0 %vm51_vm0, %v29_v34  ;;  %v2057_v33 = vld [vmem:[%s3416_s0 + $0x3a8] sm:$0xff]  ;;  %v1986_v34 = vld [vmem:[%s3416_s0 + $0x290] sm:$0xff] }
  0x26   :  { %2371 = vmatprep.mubr.msk.f32.mxu1 %vm51_vm0, %v1918_v35  ;;  %v2058_v35 = vld [vmem:[%s3416_s0 + $0x3b0] sm:$0xff] }
  0x28   :  { %2310 = vmatmul.mubr.msk.f32.gmra.mrb[14].mxu0 %vm51_vm0, %v30_v36  ;;  %v1987_v36 = vld [vmem:[%s3416_s0 + $0x298] sm:$0xff] }
  0x29   :  { %2372 = vmatmul.mubr.msk.f32.gmra.mrb[14].mxu1 %vm51_vm0, %v1919_v37  ;;  %2312 = vmatprep.mubr.msk.f32.mxu0 %vm51_vm0, %v31_v38  ;;  %v2059_v37 = vld [vmem:[%s3416_s0 + $0x3b8] sm:$0xff]  ;;  %v1988_v38 = vld [vmem:[%s3416_s0 + $0x2a0] sm:$0xff] }
  0x2a   :  { %2374 = vmatprep.mubr.msk.f32.mxu1 %vm51_vm0, %v1920_v39  ;;  %v2060_v39 = vld [vmem:[%s3416_s0 + $0x3c0] sm:$0xff] }
  0x2c   :  { %2313 = vmatmul.mubr.msk.f32.gmra.mrb[16].mxu0 %vm51_vm0, %v32_v40  ;;  %v1989_v40 = vld [vmem:[%s3416_s0 + $0x2a8] sm:$0xff] }
  0x2d   :  { %2375 = vmatmul.mubr.msk.f32.gmra.mrb[16].mxu1 %vm51_vm0, %v1921_v41  ;;  %2315 = vmatprep.mubr.msk.f32.mxu0 %vm51_vm0, %v33_v42  ;;  %v2061_v41 = vld [vmem:[%s3416_s0 + $0x3c8] sm:$0xff]  ;;  %v1990_v42 = vld [vmem:[%s3416_s0 + $0x2b0] sm:$0xff] }
  0x2e   :  { %2377 = vmatprep.mubr.msk.f32.mxu1 %vm51_vm0, %v1922_v43  ;;  %v2062_v43 = vld [vmem:[%s3416_s0 + $0x3d0] sm:$0xff] }
  0x30   :  { %2316 = vmatmul.mubr.msk.f32.gmra.mrb[18].mxu0 %vm51_vm0, %v34_v44  ;;  %v1991_v44 = vld [vmem:[%s3416_s0 + $0x2b8] sm:$0xff] }
  0x31   :  { %2378 = vmatmul.mubr.msk.f32.gmra.mrb[18].mxu1 %vm51_vm0, %v1923_v45  ;;  %2318 = vmatprep.mubr.msk.f32.mxu0 %vm51_vm0, %v35_v46  ;;  %v2063_v45 = vld [vmem:[%s3416_s0 + $0x3d8] sm:$0xff]  ;;  %v1992_v46 = vld [vmem:[%s3416_s0 + $0x2c0] sm:$0xff] }
  0x32   :  { %2380 = vmatprep.mubr.msk.f32.mxu1 %vm51_vm0, %v1924_v47  ;;  %v2064_v47 = vld [vmem:[%s3416_s0 + $0x3e0] sm:$0xff] }
  0x34   :  { %2319 = vmatmul.mubr.msk.f32.gmra.mrb[20].mxu0 %vm51_vm0, %v36_v48  ;;  %v1993_v48 = vld [vmem:[%s3416_s0 + $0x2c8] sm:$0xff] }
  0x35   :  { %2381 = vmatmul.mubr.msk.f32.gmra.mrb[20].mxu1 %vm51_vm0, %v1925_v49  ;;  %2321 = vmatprep.mubr.msk.f32.mxu0 %vm51_vm0, %v37_v50  ;;  %v2065_v49 = vld [vmem:[%s3416_s0 + $0x3e8] sm:$0xff]  ;;  %v1994_v50 = vld [vmem:[%s3416_s0 + $0x2d0] sm:$0xff] }
  0x36   :  { %2383 = vmatprep.mubr.msk.f32.mxu1 %vm51_vm0, %v1926_v51  ;;  %v2066_v51 = vld [vmem:[%s3416_s0 + $0x3f0] sm:$0xff] }
  0x38   :  { %2322 = vmatmul.mubr.msk.f32.gmra.mrb[22].mxu0 %vm51_vm0, %v38_v52  ;;  %v1995_v52 = vld [vmem:[%s3416_s0 + $0x2d8] sm:$0xff] }
  0x39   :  { %2384 = vmatmul.mubr.msk.f32.gmra.mrb[22].mxu1 %vm51_vm0, %v1927_v53  ;;  %2324 = vmatprep.mubr.msk.f32.mxu0 %vm51_vm0, %v39_v54  ;;  %v2067_v53 = vld [vmem:[%s3416_s0 + $0x3f8] sm:$0xff]  ;;  %v1996_v54 = vld [vmem:[%s3416_s0 + $0x2e0] sm:$0xff] }
  0x3a   :  { %2386 = vmatprep.mubr.msk.f32.mxu1 %vm51_vm0, %v1928_v55  ;;  %v2068_v55 = vld [vmem:[%s3416_s0 + $0x400] sm:$0xff] }
  0x3c   :  { %2325 = vmatmul.mubr.msk.f32.gmra.mrb[24].mxu0 %vm51_vm0, %v40_v56  ;;  %v1997_v56 = vld [vmem:[%s3416_s0 + $0x2e8] sm:$0xff] }
  0x3d   :  { %2387 = vmatmul.mubr.msk.f32.gmra.mrb[24].mxu1 %vm51_vm0, %v1929_v57  ;;  %2327 = vmatprep.mubr.msk.f32.mxu0 %vm51_vm0, %v41_v58  ;;  %v2069_v57 = vld [vmem:[%s3416_s0 + $0x408] sm:$0xff]  ;;  %v1998_v58 = vld [vmem:[%s3416_s0 + $0x2f0] sm:$0xff] }
  0x3e   :  { %2389 = vmatprep.mubr.msk.f32.mxu1 %vm51_vm0, %v1930_v59  ;;  %v2070_v59 = vld [vmem:[%s3416_s0 + $0x410] sm:$0xff] }
  0x40   :  { %2328 = vmatmul.mubr.msk.f32.gmra.mrb[26].mxu0 %vm51_vm0, %v42_v60  ;;  %v1999_v60 = vld [vmem:[%s3416_s0 + $0x2f8] sm:$0xff] }
  0x41   :  { %2390 = vmatmul.mubr.msk.f32.gmra.mrb[26].mxu1 %vm51_vm0, %v1931_v61  ;;  %2330 = vmatprep.mubr.msk.f32.mxu0 %vm51_vm0, %v43_v62  ;;  %v2071_v61 = vld [vmem:[%s3416_s0 + $0x418] sm:$0xff]  ;;  %v2000_v62 = vld [vmem:[%s3416_s0 + $0x300] sm:$0xff] }
  0x42   :  { %2392 = vmatprep.mubr.msk.f32.mxu1 %vm51_vm0, %v1932_v63  ;;  %v2072_v63 = vld [vmem:[%s3416_s0 + $0x420] sm:$0xff] }
  0x44   :  { %2331 = vmatmul.mubr.msk.f32.gmra.mrb[28].mxu0 %vm51_vm0, %v44_v0  ;;  %v2001_v0 = vld [vmem:[%s3416_s0 + $0x308] sm:$0xff] }
  0x45   :  { %2393 = vmatmul.mubr.msk.f32.gmra.mrb[28].mxu1 %vm51_vm0, %v1933_v1  ;;  %2333 = vmatprep.mubr.msk.f32.mxu0 %vm51_vm0, %v45_v2  ;;  %v2073_v1 = vld [vmem:[%s3416_s0 + $0x428] sm:$0xff]  ;;  %v2002_v2 = vld [vmem:[%s3416_s0 + $0x310] sm:$0xff] }
  0x46   :  { %2395 = vmatprep.mubr.msk.f32.mxu1 %vm51_vm0, %v1934_v3  ;;  %v2074_v3 = vld [vmem:[%s3416_s0 + $0x430] sm:$0xff] }
  0x48   :  { %2334 = vmatmul.mubr.msk.f32.gmra.mrb[30].mxu0 %vm51_vm0, %v46_v4  ;;  %v2003_v4 = vld [vmem:[%s3416_s0 + $0x318] sm:$0xff] }
  0x49   :  { %2396 = vmatmul.mubr.msk.f32.gmra.mrb[30].mxu1 %vm51_vm0, %v1935_v5  ;;  %2336 = vmatprep.mubr.msk.f32.mxu0 %vm51_vm0, %v47_v6  ;;  %v2075_v5 = vld [vmem:[%s3416_s0 + $0x438] sm:$0xff]  ;;  %v2004_v6 = vld [vmem:[%s3416_s0 + $0x320] sm:$0xff] }
  0x4a   :  { %2398 = vmatprep.mubr.msk.f32.mxu1 %vm51_vm0, %v1936_v7  ;;  %v2076_v7 = vld [vmem:[%s3416_s0 + $0x440] sm:$0xff] }
  0x4c   :  { %2337 = vmatmul.mubr.msk.f32.gmra.mrb[32].mxu0 %vm51_vm0, %v48_v8  ;;  %v2005_v8 = vld [vmem:[%s3416_s0 + $0x328] sm:$0xff] }
  0x4d   :  { %2399 = vmatmul.mubr.msk.f32.gmra.mrb[32].mxu1 %vm51_vm0, %v1937_v9  ;;  %2339 = vmatprep.mubr.msk.f32.mxu0 %vm51_vm0, %v49_v10  ;;  %v2077_v9 = vld [vmem:[%s3416_s0 + $0x448] sm:$0xff]  ;;  %v2006_v10 = vld [vmem:[%s3416_s0 + $0x330] sm:$0xff] }
  0x4e   :  { %2401 = vmatprep.mubr.msk.f32.mxu1 %vm51_vm0, %v1938_v11  ;;  %v2078_v11 = vld [vmem:[%s3416_s0 + $0x450] sm:$0xff] }
  0x50   :  { %2340 = vmatmul.mubr.msk.f32.gmra.mrb[34].mxu0 %vm51_vm0, %v50_v12  ;;  %v2007_v12 = vld [vmem:[%s3416_s0 + $0x338] sm:$0xff] }
  0x51   :  { %2402 = vmatmul.mubr.msk.f32.gmra.mrb[34].mxu1 %vm51_vm0, %v1939_v13  ;;  %2412 = vmatprep.mubr.msk.f32.mxu0 %vm51_vm0, %v1976_v14  ;;  %v2079_v13 = vld [vmem:[%s3416_s0 + $0x458] sm:$0xff]  ;;  %v2008_v14 = vld [vmem:[%s3416_s0 + $0x340] sm:$0xff] }
  0x52   :  { %2474 = vmatprep.mubr.msk.f32.mxu1 %vm51_vm0, %v2048_v15  ;;  %v2080_v15 = vld [vmem:[%s3416_s0 + $0x460] sm:$0xff] }
  0x54   :  { %2413 = vmatmul.mubr.msk.f32.vlgmr.msra.gmra.mrb[36].mxu0 %vm51_vm0, %v1977_v16  ;;  %v2009_v16 = vld [vmem:[%s3416_s0 + $0x348] sm:$0xff] }
  0x55   :  { %2475 = vmatmul.mubr.msk.f32.vlgmr.msra.gmra.mrb[36].mxu1 %vm51_vm0, %v2049_v17  ;;  %2415 = vmatprep.mubr.msk.f32.mxu0 %vm51_vm0, %v1978_v18  ;;  %v2081_v17 = vld [vmem:[%s3416_s0 + $0x468] sm:$0xff]  ;;  %v2010_v18 = vld [vmem:[%s3416_s0 + $0x350] sm:$0xff] }
  0x56   :  { %2477 = vmatprep.mubr.msk.f32.mxu1 %vm51_vm0, %v2050_v19  ;;  %v2082_v19 = vld [vmem:[%s3416_s0 + $0x470] sm:$0xff] }
  0x58   :  { %2416 = vmatmul.mubr.msk.f32.gmra.mrb[38].mxu0 %vm51_vm0, %v1979_v20  ;;  %v2011_v20 = vld [vmem:[%s3416_s0 + $0x358] sm:$0xff] }
  0x59   :  { %2478 = vmatmul.mubr.msk.f32.gmra.mrb[38].mxu1 %vm51_vm0, %v2051_v21  ;;  %2418 = vmatprep.mubr.msk.f32.mxu0 %vm51_vm0, %v1980_v22  ;;  %v2083_v21 = vld [vmem:[%s3416_s0 + $0x478] sm:$0xff] }
  0x5a   :  { %2480 = vmatprep.mubr.msk.f32.mxu1 %vm51_vm0, %v2052_v23 }
  0x5c   :  { %2419 = vmatmul.mubr.msk.f32.gmra.mrb[40].mxu0 %vm51_vm0, %v1981_v24 }
  0x5d   :  { %2481 = vmatmul.mubr.msk.f32.gmra.mrb[40].mxu1 %vm51_vm0, %v2053_v25  ;;  %2421 = vmatprep.mubr.msk.f32.mxu0 %vm51_vm0, %v1982_v26 }
  0x5e   :  { %2483 = vmatprep.mubr.msk.f32.mxu1 %vm51_vm0, %v2054_v27 }
  0x60   :  { %2422 = vmatmul.mubr.msk.f32.gmra.mrb[42].mxu0 %vm51_vm0, %v1983_v28 }
  0x61   :  { %2484 = vmatmul.mubr.msk.f32.gmra.mrb[42].mxu1 %vm51_vm0, %v2055_v29  ;;  %2424 = vmatprep.mubr.msk.f32.mxu0 %vm51_vm0, %v1984_v30 }
  0x62   :  { %2486 = vmatprep.mubr.msk.f32.mxu1 %vm51_vm0, %v2056_v31 }
  0x64   :  { %2425 = vmatmul.mubr.msk.f32.gmra.mrb[44].mxu0 %vm51_vm0, %v1985_v32 }
  0x65   :  { %2487 = vmatmul.mubr.msk.f32.gmra.mrb[44].mxu1 %vm51_vm0, %v2057_v33  ;;  %2427 = vmatprep.mubr.msk.f32.mxu0 %vm51_vm0, %v1986_v34 }
  0x66   :  { %2489 = vmatprep.mubr.msk.f32.mxu1 %vm51_vm0, %v2058_v35 }
  0x68   :  { %2428 = vmatmul.mubr.msk.f32.gmra.mrb[46].mxu0 %vm51_vm0, %v1987_v36 }
  0x69   :  { %2490 = vmatmul.mubr.msk.f32.gmra.mrb[46].mxu1 %vm51_vm0, %v2059_v37  ;;  %2430 = vmatprep.mubr.msk.f32.mxu0 %vm51_vm0, %v1988_v38 }
  0x6a   :  { %2492 = vmatprep.mubr.msk.f32.mxu1 %vm51_vm0, %v2060_v39 }
  0x6c   :  { %2431 = vmatmul.mubr.msk.f32.gmra.mrb[48].mxu0 %vm51_vm0, %v1989_v40 }
  0x6d   :  { %2493 = vmatmul.mubr.msk.f32.gmra.mrb[48].mxu1 %vm51_vm0, %v2061_v41  ;;  %2433 = vmatprep.mubr.msk.f32.mxu0 %vm51_vm0, %v1990_v42 }
  0x6e   :  { %2495 = vmatprep.mubr.msk.f32.mxu1 %vm51_vm0, %v2062_v43 }
  0x70   :  { %2434 = vmatmul.mubr.msk.f32.gmra.mrb[50].mxu0 %vm51_vm0, %v1991_v44 }
  0x71   :  { %2496 = vmatmul.mubr.msk.f32.gmra.mrb[50].mxu1 %vm51_vm0, %v2063_v45  ;;  %2436 = vmatprep.mubr.msk.f32.mxu0 %vm51_vm0, %v1992_v46 }
  0x72   :  { %2498 = vmatprep.mubr.msk.f32.mxu1 %vm51_vm0, %v2064_v47 }
  0x74   :  { %2437 = vmatmul.mubr.msk.f32.gmra.mrb[52].mxu0 %vm51_vm0, %v1993_v48 }
  0x75   :  { %2499 = vmatmul.mubr.msk.f32.gmra.mrb[52].mxu1 %vm51_vm0, %v2065_v49  ;;  %2439 = vmatprep.mubr.msk.f32.mxu0 %vm51_vm0, %v1994_v50 }
  0x76   :  { %2501 = vmatprep.mubr.msk.f32.mxu1 %vm51_vm0, %v2066_v51 }
  0x78   :  { %2440 = vmatmul.mubr.msk.f32.gmra.mrb[54].mxu0 %vm51_vm0, %v1995_v52 }
  0x79   :  { %2502 = vmatmul.mubr.msk.f32.gmra.mrb[54].mxu1 %vm51_vm0, %v2067_v53  ;;  %2442 = vmatprep.mubr.msk.f32.mxu0 %vm51_vm0, %v1996_v54 }
  0x7a   :  { %2504 = vmatprep.mubr.msk.f32.mxu1 %vm51_vm0, %v2068_v55 }
  0x7c   :  { %2443 = vmatmul.mubr.msk.f32.gmra.mrb[56].mxu0 %vm51_vm0, %v1997_v56 }
  0x7d   :  { %2505 = vmatmul.mubr.msk.f32.gmra.mrb[56].mxu1 %vm51_vm0, %v2069_v57  ;;  %2445 = vmatprep.mubr.msk.f32.mxu0 %vm51_vm0, %v1998_v58 }
  0x7e   :  { %2507 = vmatprep.mubr.msk.f32.mxu1 %vm51_vm0, %v2070_v59 }
  0x80   :  { %2446 = vmatmul.mubr.msk.f32.gmra.mrb[58].mxu0 %vm51_vm0, %v1999_v60 }
  0x81   :  { %2508 = vmatmul.mubr.msk.f32.gmra.mrb[58].mxu1 %vm51_vm0, %v2071_v61  ;;  %2448 = vmatprep.mubr.msk.f32.mxu0 %vm51_vm0, %v2000_v62 }
  0x82   :  { %2510 = vmatprep.mubr.msk.f32.mxu1 %vm51_vm0, %v2072_v63 }
  0x84   :  { %2449 = vmatmul.mubr.msk.f32.gmra.mrb[60].mxu0 %vm51_vm0, %v2001_v0 }
  0x85   :  { %2511 = vmatmul.mubr.msk.f32.gmra.mrb[60].mxu1 %vm51_vm0, %v2073_v1  ;;  %2451 = vmatprep.mubr.msk.f32.mxu0 %vm51_vm0, %v2002_v2 }
  0x86   :  { %2513 = vmatprep.mubr.msk.f32.mxu1 %vm51_vm0, %v2074_v3 }
  0x88   :  { %2452 = vmatmul.mubr.msk.f32.gmra.mrb[62].mxu0 %vm51_vm0, %v2003_v4 }
  0x89   :  { %2514 = vmatmul.mubr.msk.f32.gmra.mrb[62].mxu1 %vm51_vm0, %v2075_v5  ;;  %2454 = vmatprep.mubr.msk.f32.mxu0 %vm51_vm0, %v2004_v6 }
  0x8a   :  { %2516 = vmatprep.mubr.msk.f32.mxu1 %vm51_vm0, %v2076_v7 }
  0x8c   :  { %2455 = vmatmul.mubr.msk.f32.gmra.mrb[64].mxu0 %vm51_vm0, %v2005_v8 }
  0x8d   :  { %2517 = vmatmul.mubr.msk.f32.gmra.mrb[64].mxu1 %vm51_vm0, %v2077_v9  ;;  %2457 = vmatprep.mubr.msk.f32.mxu0 %vm51_vm0, %v2006_v10 }
  0x8e   :  { %2519 = vmatprep.mubr.msk.f32.mxu1 %vm51_vm0, %v2078_v11 }
  0x90   :  { %2458 = vmatmul.mubr.msk.f32.gmra.mrb[66].mxu0 %vm51_vm0, %v2007_v12 }
  0x91   :  { %2520 = vmatmul.mubr.msk.f32.gmra.mrb[66].mxu1 %vm51_vm0, %v2079_v13  ;;  %2460 = vmatprep.mubr.msk.f32.mxu0 %vm51_vm0, %v2008_v14 }
  0x92   :  { %2522 = vmatprep.mubr.msk.f32.mxu1 %vm51_vm0, %v2080_v15 }
  0x94   :  { %2461 = vmatmul.mubr.msk.f32.gmra.mrb[68].mxu0 %vm51_vm0, %v2009_v16 }
  0x95   :  { %2523 = vmatmul.mubr.msk.f32.gmra.mrb[68].mxu1 %vm51_vm0, %v2081_v17  ;;  %2463 = vmatprep.mubr.msk.f32.mxu0 %vm51_vm0, %v2010_v18 }
  0x96   :  { %2525 = vmatprep.mubr.msk.f32.mxu1 %vm51_vm0, %v2082_v19 }
  0x98   :  { %2464 = vmatmul.mubr.msk.f32.gmra.mrb[70].mxu0 %vm51_vm0, %v2011_v20 }
  0x99   :  { %2526 = vmatmul.mubr.msk.f32.gmra.mrb[70].mxu1 %vm51_vm0, %v2083_v21 }
  0xdf   :  { %v2290_v22 = vpop.f32.mrb[0].mxu0 }
  0xe0   :  { %v2352_v23 = vpop.f32.mrb[0].mxu1  ;;  %v406_v24 = vmax.f32 %v2290_v22, 0.0  ;;  %v226_v26 = vpop.f32.mrb[1].mxu0 }
  0xe1   :  { %v832_v25 = vmax.f32 %v2352_v23, 0.0  ;;  %v652_v27 = vpop.f32.mrb[1].mxu1  ;;  %v405_v28 = vmax.f32 %v226_v26, 0.0 }
  0xe2   :  { %v831_v29 = vmax.f32 %v652_v27, 0.0 }
  0xe3   :  { %v3163_v30 = vmax.f32 %v406_v24, %v832_v25  ;;  %v2293_v32 = vpop.f32.mrb[2].mxu0 }
  0xe4   :  { %v3165_v31 = vmax.f32 %v405_v28, %v831_v29  ;;  %v2355_v33 = vpop.f32.mrb[2].mxu1  ;;  %v408_v34 = vmax.f32 %v2293_v32, 0.0  ;;  %v236_v36 = vpop.f32.mrb[3].mxu0 }
  0xe5   :  { %v834_v35 = vmax.f32 %v2355_v33, 0.0  ;;  %v662_v37 = vpop.f32.mrb[3].mxu1  ;;  %v407_v38 = vmax.f32 %v236_v36, 0.0 }
  0xe6   :  { %v833_v39 = vmax.f32 %v662_v37, 0.0 }
  0xe7   :  { %v3167_v40 = vmax.f32 %v408_v34, %v834_v35  ;;  %v2296_v42 = vpop.f32.mrb[4].mxu0 }
  0xe8   :  { %v3169_v41 = vmax.f32 %v407_v38, %v833_v39  ;;  %v2358_v43 = vpop.f32.mrb[4].mxu1  ;;  %v410_v44 = vmax.f32 %v2296_v42, 0.0  ;;  %v246_v46 = vpop.f32.mrb[5].mxu0 }
  0xe9   :  { %v836_v45 = vmax.f32 %v2358_v43, 0.0  ;;  %v672_v47 = vpop.f32.mrb[5].mxu1  ;;  %v409_v48 = vmax.f32 %v246_v46, 0.0 }
  0xea   :  { %v835_v49 = vmax.f32 %v672_v47, 0.0 }
  0xeb   :  { %v3171_v50 = vmax.f32 %v410_v44, %v836_v45  ;;  %v2299_v52 = vpop.f32.mrb[6].mxu0 }
  0xec   :  { %v3173_v51 = vmax.f32 %v409_v48, %v835_v49  ;;  %v2361_v53 = vpop.f32.mrb[6].mxu1  ;;  %v412_v54 = vmax.f32 %v2299_v52, 0.0  ;;  %v256_v56 = vpop.f32.mrb[7].mxu0 }
  0xed   :  { %v838_v55 = vmax.f32 %v2361_v53, 0.0  ;;  %v682_v57 = vpop.f32.mrb[7].mxu1  ;;  %v411_v58 = vmax.f32 %v256_v56, 0.0 }
  0xee   :  { %v837_v59 = vmax.f32 %v682_v57, 0.0 }
  0xef   :  { %v3175_v60 = vmax.f32 %v412_v54, %v838_v55  ;;  %v2302_v62 = vpop.f32.mrb[8].mxu0 }
  0xf0   :  { %v3177_v61 = vmax.f32 %v411_v58, %v837_v59  ;;  %v2364_v63 = vpop.f32.mrb[8].mxu1  ;;  %v414_v0 = vmax.f32 %v2302_v62, 0.0  ;;  %v266_v2 = vpop.f32.mrb[9].mxu0 }
  0xf1   :  { %v840_v1 = vmax.f32 %v2364_v63, 0.0  ;;  %v692_v3 = vpop.f32.mrb[9].mxu1  ;;  %v413_v4 = vmax.f32 %v266_v2, 0.0 }
  0xf2   :  { %v839_v5 = vmax.f32 %v692_v3, 0.0 }
  0xf3   :  { %v3179_v6 = vmax.f32 %v414_v0, %v840_v1  ;;  %v2305_v8 = vpop.f32.mrb[10].mxu0 }
  0xf4   :  { %v3181_v7 = vmax.f32 %v413_v4, %v839_v5  ;;  %v2367_v9 = vpop.f32.mrb[10].mxu1  ;;  %v416_v10 = vmax.f32 %v2305_v8, 0.0  ;;  %v276_v12 = vpop.f32.mrb[11].mxu0 }
  0xf5   :  { %v842_v11 = vmax.f32 %v2367_v9, 0.0  ;;  %v702_v13 = vpop.f32.mrb[11].mxu1  ;;  %v415_v14 = vmax.f32 %v276_v12, 0.0 }
  0xf6   :  { %v841_v15 = vmax.f32 %v702_v13, 0.0 }
  0xf7   :  { %v3183_v16 = vmax.f32 %v416_v10, %v842_v11  ;;  %v2308_v18 = vpop.f32.mrb[12].mxu0 }
  0xf8   :  { %v3185_v17 = vmax.f32 %v415_v14, %v841_v15  ;;  %v2370_v19 = vpop.f32.mrb[12].mxu1  ;;  %v418_v20 = vmax.f32 %v2308_v18, 0.0  ;;  %v286_v22 = vpop.f32.mrb[13].mxu0 }
  0xf9   :  { %v844_v21 = vmax.f32 %v2370_v19, 0.0  ;;  %v712_v23 = vpop.f32.mrb[13].mxu1  ;;  %v417_v24 = vmax.f32 %v286_v22, 0.0 }
  0xfa   :  { %v843_v25 = vmax.f32 %v712_v23, 0.0 }
  0xfb   :  { %v3187_v26 = vmax.f32 %v418_v20, %v844_v21  ;;  %v2311_v28 = vpop.f32.mrb[14].mxu0 }
  0xfc   :  { %v3189_v27 = vmax.f32 %v417_v24, %v843_v25  ;;  %v2373_v29 = vpop.f32.mrb[14].mxu1  ;;  %v420_v32 = vmax.f32 %v2311_v28, 0.0  ;;  %v296_v34 = vpop.f32.mrb[15].mxu0 }
  0xfd   :  { %v846_v33 = vmax.f32 %v2373_v29, 0.0  ;;  %v722_v35 = vpop.f32.mrb[15].mxu1  ;;  %v419_v36 = vmax.f32 %v296_v34, 0.0 }
  0xfe   :  { %v845_v37 = vmax.f32 %v722_v35, 0.0 }
  0xff   :  { %v3191_v38 = vmax.f32 %v420_v32, %v846_v33  ;;  %v2314_v42 = vpop.f32.mrb[16].mxu0 }
 0x100   :  { %v3193_v39 = vmax.f32 %v419_v36, %v845_v37  ;;  %v2376_v43 = vpop.f32.mrb[16].mxu1  ;;  %v422_v44 = vmax.f32 %v2314_v42, 0.0  ;;  %v306_v46 = vpop.f32.mrb[17].mxu0 }
 0x101   :  { %v848_v45 = vmax.f32 %v2376_v43, 0.0  ;;  %v732_v47 = vpop.f32.mrb[17].mxu1  ;;  %v421_v48 = vmax.f32 %v306_v46, 0.0 }
 0x102   :  { %v847_v49 = vmax.f32 %v732_v47, 0.0 }
 0x103   :  { %v3195_v52 = vmax.f32 %v422_v44, %v848_v45  ;;  %v2317_v54 = vpop.f32.mrb[18].mxu0 }
 0x104   :  { %v3197_v53 = vmax.f32 %v421_v48, %v847_v49  ;;  %v2379_v55 = vpop.f32.mrb[18].mxu1  ;;  %v424_v56 = vmax.f32 %v2317_v54, 0.0  ;;  %v316_v58 = vpop.f32.mrb[19].mxu0 }
 0x105   :  { %v850_v57 = vmax.f32 %v2379_v55, 0.0  ;;  %v742_v59 = vpop.f32.mrb[19].mxu1  ;;  %v423_v62 = vmax.f32 %v316_v58, 0.0 }
 0x106   :  { %v849_v63 = vmax.f32 %v742_v59, 0.0 }
 0x107   :  { %v3199_v0 = vmax.f32 %v424_v56, %v850_v57  ;;  %v2320_v2 = vpop.f32.mrb[20].mxu0 }
 0x108   :  { %v3201_v1 = vmax.f32 %v423_v62, %v849_v63  ;;  %v2382_v3 = vpop.f32.mrb[20].mxu1  ;;  %v426_v4 = vmax.f32 %v2320_v2, 0.0  ;;  %v326_v8 = vpop.f32.mrb[21].mxu0 }
 0x109   :  { %v852_v5 = vmax.f32 %v2382_v3, 0.0  ;;  %v752_v9 = vpop.f32.mrb[21].mxu1  ;;  %v425_v10 = vmax.f32 %v326_v8, 0.0 }
 0x10a   :  { %v851_v11 = vmax.f32 %v752_v9, 0.0 }
 0x10b   :  { %v3203_v12 = vmax.f32 %v426_v4, %v852_v5  ;;  %v2323_v14 = vpop.f32.mrb[22].mxu0 }
 0x10c   :  { %v3205_v13 = vmax.f32 %v425_v10, %v851_v11  ;;  %v2385_v15 = vpop.f32.mrb[22].mxu1  ;;  %v428_v18 = vmax.f32 %v2323_v14, 0.0  ;;  %v336_v20 = vpop.f32.mrb[23].mxu0 }
 0x10d   :  { %v854_v19 = vmax.f32 %v2385_v15, 0.0  ;;  %v762_v21 = vpop.f32.mrb[23].mxu1  ;;  %v427_v22 = vmax.f32 %v336_v20, 0.0 }
 0x10e   :  { %v853_v23 = vmax.f32 %v762_v21, 0.0 }
 0x10f   :  { %v3207_v24 = vmax.f32 %v428_v18, %v854_v19  ;;  %v2326_v28 = vpop.f32.mrb[24].mxu0 }
 0x110   :  { %v3209_v25 = vmax.f32 %v427_v22, %v853_v23  ;;  %v2388_v29 = vpop.f32.mrb[24].mxu1  ;;  %v430_v32 = vmax.f32 %v2326_v28, 0.0  ;;  %v346_v34 = vpop.f32.mrb[25].mxu0 }
 0x111   :  { %v856_v33 = vmax.f32 %v2388_v29, 0.0  ;;  %v772_v35 = vpop.f32.mrb[25].mxu1  ;;  %v429_v36 = vmax.f32 %v346_v34, 0.0 }
 0x112   :  { %v855_v37 = vmax.f32 %v772_v35, 0.0 }
 0x113   :  { %v3211_v42 = vmax.f32 %v430_v32, %v856_v33  ;;  %v2329_v44 = vpop.f32.mrb[26].mxu0 }
 0x114   :  { %v3213_v43 = vmax.f32 %v429_v36, %v855_v37  ;;  %v2391_v45 = vpop.f32.mrb[26].mxu1  ;;  %v432_v46 = vmax.f32 %v2329_v44, 0.0  ;;  %v356_v48 = vpop.f32.mrb[27].mxu0 }
 0x115   :  { %v858_v47 = vmax.f32 %v2391_v45, 0.0  ;;  %v782_v49 = vpop.f32.mrb[27].mxu1  ;;  %v431_v54 = vmax.f32 %v356_v48, 0.0 }
 0x116   :  { %v857_v55 = vmax.f32 %v782_v49, 0.0 }
 0x117   :  { %v3215_v56 = vmax.f32 %v432_v46, %v858_v47  ;;  %v2332_v58 = vpop.f32.mrb[28].mxu0 }
 0x118   :  { %v3217_v57 = vmax.f32 %v431_v54, %v857_v55  ;;  %v2394_v59 = vpop.f32.mrb[28].mxu1  ;;  %v434_v62 = vmax.f32 %v2332_v58, 0.0  ;;  %v366_v2 = vpop.f32.mrb[29].mxu0 }
 0x119   :  { %v860_v63 = vmax.f32 %v2394_v59, 0.0  ;;  %v792_v3 = vpop.f32.mrb[29].mxu1  ;;  %v433_v4 = vmax.f32 %v366_v2, 0.0 }
 0x11a   :  { %v859_v5 = vmax.f32 %v792_v3, 0.0 }
 0x11b   :  { %v3219_v8 = vmax.f32 %v434_v62, %v860_v63  ;;  %v2335_v10 = vpop.f32.mrb[30].mxu0 }
 0x11c   :  { %v3221_v9 = vmax.f32 %v433_v4, %v859_v5  ;;  %v2397_v11 = vpop.f32.mrb[30].mxu1  ;;  %v436_v14 = vmax.f32 %v2335_v10, 0.0  ;;  %v376_v18 = vpop.f32.mrb[31].mxu0 }
 0x11d   :  { %v862_v15 = vmax.f32 %v2397_v11, 0.0  ;;  %v802_v19 = vpop.f32.mrb[31].mxu1  ;;  %v435_v20 = vmax.f32 %v376_v18, 0.0 }
 0x11e   :  { %v861_v21 = vmax.f32 %v802_v19, 0.0 }
 0x11f   :  { %v3223_v22 = vmax.f32 %v436_v14, %v862_v15  ;;  %v2338_v28 = vpop.f32.mrb[32].mxu0 }
 0x120   :  { %v3225_v23 = vmax.f32 %v435_v20, %v861_v21  ;;  %v2400_v29 = vpop.f32.mrb[32].mxu1  ;;  %v438_v32 = vmax.f32 %v2338_v28, 0.0  ;;  %v386_v34 = vpop.f32.mrb[33].mxu0 }
 0x121   :  { %v864_v33 = vmax.f32 %v2400_v29, 0.0  ;;  %v812_v35 = vpop.f32.mrb[33].mxu1  ;;  %v437_v36 = vmax.f32 %v386_v34, 0.0 }
 0x122   :  { %v863_v37 = vmax.f32 %v812_v35, 0.0 }
 0x123   :  { %v3227_v44 = vmax.f32 %v438_v32, %v864_v33  ;;  %v2341_v46 = vpop.f32.mrb[34].mxu0 }
 0x124   :  { %v3229_v45 = vmax.f32 %v437_v36, %v863_v37  ;;  %v2403_v47 = vpop.f32.mrb[34].mxu1  ;;  %v440_v48 = vmax.f32 %v2341_v46, 0.0  ;;  %v396_v54 = vpop.f32.mrb[35].mxu0 }
 0x125   :  { %v866_v49 = vmax.f32 %v2403_v47, 0.0  ;;  %v822_v55 = vpop.f32.mrb[35].mxu1  ;;  %v439_v58 = vmax.f32 %v396_v54, 0.0 }
 0x126   :  { %v865_v59 = vmax.f32 %v822_v55, 0.0 }
 0x127   :  { %v3231_v62 = vmax.f32 %v440_v48, %v866_v49  ;;  %v2414_v2 = vpop.f32.mrb[36].mxu0 }
 0x128   :  { %v3233_v63 = vmax.f32 %v439_v58, %v865_v59  ;;  %v2476_v3 = vpop.f32.mrb[36].mxu1  ;;  %v1294_v4 = vmax.f32 %v2414_v2, 0.0  ;;  %v1114_v5 = vpop.f32.mrb[37].mxu0 }
 0x129   :  { %v1756_v10 = vmax.f32 %v2476_v3, 0.0  ;;  %v1576_v11 = vpop.f32.mrb[37].mxu1  ;;  %v1293_v14 = vmax.f32 %v1114_v5, 0.0 }
 0x12a   :  { %v1755_v15 = vmax.f32 %v1576_v11, 0.0  ;;  %v1330_v18 = vmax.f32 %v3163_v30, %v1294_v4 }
 0x12b   :  { %v1329_v19 = vmax.f32 %v3165_v31, %v1293_v14  ;;  %v2417_v20 = vpop.f32.mrb[38].mxu0 }
 0x12c   :  { %v2479_v21 = vpop.f32.mrb[38].mxu1  ;;  %v1792_v28 = vmax.f32 %v1330_v18, %v1756_v10  ;;  %v1296_v29 = vmax.f32 %v2417_v20, 0.0  ;;  %v1124_v32 = vpop.f32.mrb[39].mxu0 }
 0x12d   :  { %v1758_v33 = vmax.f32 %v2479_v21, 0.0  ;;  %v1586_v34 = vpop.f32.mrb[39].mxu1  ;;  %v1791_v35 = vmax.f32 %v1329_v19, %v1755_v15  ;;  %v1295_v36 = vmax.f32 %v1124_v32, 0.0 }
 0x12e   :  { %v1757_v37 = vmax.f32 %v1586_v34, 0.0  ;;  %1829 = vst.msk [vmem:[%s3417_s2 + $0x8] sm:$0xff] %vm1827_vm1, %v1792_v28  ;;  %v1332_v30 = vmax.f32 %v3167_v40, %v1296_v29 }
 0x12f   :  { %1828 = vst.msk [vmem:[%s3417_s2] sm:$0xff] %vm1827_vm1, %v1791_v35  ;;  %v1331_v31 = vmax.f32 %v3169_v41, %v1295_v36  ;;  %v2420_v46 = vpop.f32.mrb[40].mxu0 }
 0x130   :  { %v2482_v47 = vpop.f32.mrb[40].mxu1  ;;  %v1794_v48 = vmax.f32 %v1332_v30, %v1758_v33  ;;  %v1298_v49 = vmax.f32 %v2420_v46, 0.0  ;;  %v1134_v54 = vpop.f32.mrb[41].mxu0 }
 0x131   :  { %v1760_v55 = vmax.f32 %v2482_v47, 0.0  ;;  %v1596_v58 = vpop.f32.mrb[41].mxu1  ;;  %v1793_v59 = vmax.f32 %v1331_v31, %v1757_v37  ;;  %v1297_v2 = vmax.f32 %v1134_v54, 0.0 }
 0x132   :  { %v1759_v3 = vmax.f32 %v1596_v58, 0.0  ;;  %1831 = vst.msk [vmem:[%s3417_s2 + $0x18] sm:$0xff] %vm1827_vm1, %v1794_v48  ;;  %v1334_v40 = vmax.f32 %v3171_v50, %v1298_v49 }
 0x133   :  { %1830 = vst.msk [vmem:[%s3417_s2 + $0x10] sm:$0xff] %vm1827_vm1, %v1793_v59  ;;  %v1333_v41 = vmax.f32 %v3173_v51, %v1297_v2  ;;  %v2423_v4 = vpop.f32.mrb[42].mxu0 }
 0x134   :  { %v2485_v5 = vpop.f32.mrb[42].mxu1  ;;  %v1796_v10 = vmax.f32 %v1334_v40, %v1760_v55  ;;  %v1300_v11 = vmax.f32 %v2423_v4, 0.0  ;;  %v1144_v14 = vpop.f32.mrb[43].mxu0 }
 0x135   :  { %v1762_v15 = vmax.f32 %v2485_v5, 0.0  ;;  %v1606_v18 = vpop.f32.mrb[43].mxu1  ;;  %v1795_v19 = vmax.f32 %v1333_v41, %v1759_v3  ;;  %v1299_v20 = vmax.f32 %v1144_v14, 0.0 }
 0x136   :  { %v1761_v21 = vmax.f32 %v1606_v18, 0.0  ;;  %1833 = vst.msk [vmem:[%s3417_s2 + $0x28] sm:$0xff] %vm1827_vm1, %v1796_v10  ;;  %v1336_v50 = vmax.f32 %v3175_v60, %v1300_v11 }
 0x137   :  { %1832 = vst.msk [vmem:[%s3417_s2 + $0x20] sm:$0xff] %vm1827_vm1, %v1795_v19  ;;  %v1335_v51 = vmax.f32 %v3177_v61, %v1299_v20  ;;  %v2426_v28 = vpop.f32.mrb[44].mxu0 }
 0x138   :  { %v2488_v29 = vpop.f32.mrb[44].mxu1  ;;  %v1798_v32 = vmax.f32 %v1336_v50, %v1762_v15  ;;  %v1302_v33 = vmax.f32 %v2426_v28, 0.0  ;;  %v1154_v34 = vpop.f32.mrb[45].mxu0 }
 0x139   :  { %v1764_v35 = vmax.f32 %v2488_v29, 0.0  ;;  %v1616_v36 = vpop.f32.mrb[45].mxu1  ;;  %v1797_v37 = vmax.f32 %v1335_v51, %v1761_v21  ;;  %v1301_v30 = vmax.f32 %v1154_v34, 0.0 }
 0x13a   :  { %v1763_v31 = vmax.f32 %v1616_v36, 0.0  ;;  %1835 = vst.msk [vmem:[%s3417_s2 + $0x38] sm:$0xff] %vm1827_vm1, %v1798_v32  ;;  %v1338_v60 = vmax.f32 %v3179_v6, %v1302_v33 }
 0x13b   :  { %1834 = vst.msk [vmem:[%s3417_s2 + $0x30] sm:$0xff] %vm1827_vm1, %v1797_v37  ;;  %v1337_v61 = vmax.f32 %v3181_v7, %v1301_v30  ;;  %v2429_v46 = vpop.f32.mrb[46].mxu0 }
 0x13c   :  { %v2491_v47 = vpop.f32.mrb[46].mxu1  ;;  %v1800_v48 = vmax.f32 %v1338_v60, %v1764_v35  ;;  %v1304_v49 = vmax.f32 %v2429_v46, 0.0  ;;  %v1164_v54 = vpop.f32.mrb[47].mxu0 }
 0x13d   :  { %v1766_v55 = vmax.f32 %v2491_v47, 0.0  ;;  %v1626_v58 = vpop.f32.mrb[47].mxu1  ;;  %v1799_v59 = vmax.f32 %v1337_v61, %v1763_v31  ;;  %v1303_v2 = vmax.f32 %v1164_v54, 0.0 }
 0x13e   :  { %v1765_v3 = vmax.f32 %v1626_v58, 0.0  ;;  %1837 = vst.msk [vmem:[%s3417_s2 + $0x48] sm:$0xff] %vm1827_vm1, %v1800_v48  ;;  %v1340_v6 = vmax.f32 %v3183_v16, %v1304_v49 }
 0x13f   :  { %1836 = vst.msk [vmem:[%s3417_s2 + $0x40] sm:$0xff] %vm1827_vm1, %v1799_v59  ;;  %v1339_v7 = vmax.f32 %v3185_v17, %v1303_v2  ;;  %v2432_v40 = vpop.f32.mrb[48].mxu0 }
 0x140   :  { %v2494_v41 = vpop.f32.mrb[48].mxu1  ;;  %v1802_v4 = vmax.f32 %v1340_v6, %v1766_v55  ;;  %v1306_v5 = vmax.f32 %v2432_v40, 0.0  ;;  %v1174_v10 = vpop.f32.mrb[49].mxu0 }
 0x141   :  { %v1768_v11 = vmax.f32 %v2494_v41, 0.0  ;;  %v1636_v14 = vpop.f32.mrb[49].mxu1  ;;  %v1801_v15 = vmax.f32 %v1339_v7, %v1765_v3  ;;  %v1305_v18 = vmax.f32 %v1174_v10, 0.0 }
 0x142   :  { %v1767_v19 = vmax.f32 %v1636_v14, 0.0  ;;  %1839 = vst.msk [vmem:[%s3417_s2 + $0x58] sm:$0xff] %vm1827_vm1, %v1802_v4  ;;  %v1342_v16 = vmax.f32 %v3187_v26, %v1306_v5 }
 0x143   :  { %1838 = vst.msk [vmem:[%s3417_s2 + $0x50] sm:$0xff] %vm1827_vm1, %v1801_v15  ;;  %v1341_v17 = vmax.f32 %v3189_v27, %v1305_v18  ;;  %v2435_v20 = vpop.f32.mrb[50].mxu0 }
 0x144   :  { %v2497_v21 = vpop.f32.mrb[50].mxu1  ;;  %v1804_v50 = vmax.f32 %v1342_v16, %v1768_v11  ;;  %v1308_v51 = vmax.f32 %v2435_v20, 0.0  ;;  %v1184_v28 = vpop.f32.mrb[51].mxu0 }
 0x145   :  { %v1770_v29 = vmax.f32 %v2497_v21, 0.0  ;;  %v1646_v32 = vpop.f32.mrb[51].mxu1  ;;  %v1803_v33 = vmax.f32 %v1341_v17, %v1767_v19  ;;  %v1307_v34 = vmax.f32 %v1184_v28, 0.0 }
 0x146   :  { %v1769_v35 = vmax.f32 %v1646_v32, 0.0  ;;  %1841 = vst.msk [vmem:[%s3417_s2 + $0x68] sm:$0xff] %vm1827_vm1, %v1804_v50  ;;  %v1344_v26 = vmax.f32 %v3191_v38, %v1308_v51 }
 0x147   :  { %1840 = vst.msk [vmem:[%s3417_s2 + $0x60] sm:$0xff] %vm1827_vm1, %v1803_v33  ;;  %v1343_v27 = vmax.f32 %v3193_v39, %v1307_v34  ;;  %v2438_v36 = vpop.f32.mrb[52].mxu0 }
 0x148   :  { %v2500_v37 = vpop.f32.mrb[52].mxu1  ;;  %v1806_v30 = vmax.f32 %v1344_v26, %v1770_v29  ;;  %v1310_v31 = vmax.f32 %v2438_v36, 0.0  ;;  %v1194_v60 = vpop.f32.mrb[53].mxu0 }
 0x149   :  { %v1772_v61 = vmax.f32 %v2500_v37, 0.0  ;;  %v1656_v46 = vpop.f32.mrb[53].mxu1  ;;  %v1805_v47 = vmax.f32 %v1343_v27, %v1769_v35  ;;  %v1309_v48 = vmax.f32 %v1194_v60, 0.0 }
 0x14a   :  { %v1771_v49 = vmax.f32 %v1656_v46, 0.0  ;;  %1843 = vst.msk [vmem:[%s3417_s2 + $0x78] sm:$0xff] %vm1827_vm1, %v1806_v30  ;;  %v1346_v38 = vmax.f32 %v3195_v52, %v1310_v31 }
 0x14b   :  { %1842 = vst.msk [vmem:[%s3417_s2 + $0x70] sm:$0xff] %vm1827_vm1, %v1805_v47  ;;  %v1345_v39 = vmax.f32 %v3197_v53, %v1309_v48  ;;  %v2441_v54 = vpop.f32.mrb[54].mxu0 }
 0x14c   :  { %v2503_v55 = vpop.f32.mrb[54].mxu1  ;;  %v1808_v58 = vmax.f32 %v1346_v38, %v1772_v61  ;;  %v1312_v59 = vmax.f32 %v2441_v54, 0.0  ;;  %v1204_v2 = vpop.f32.mrb[55].mxu0 }
 0x14d   :  { %v1774_v3 = vmax.f32 %v2503_v55, 0.0  ;;  %v1666_v6 = vpop.f32.mrb[55].mxu1  ;;  %v1807_v7 = vmax.f32 %v1345_v39, %v1771_v49  ;;  %v1311_v40 = vmax.f32 %v1204_v2, 0.0 }
 0x14e   :  { %v1773_v41 = vmax.f32 %v1666_v6, 0.0  ;;  %1845 = vst.msk [vmem:[%s3417_s2 + $0x88] sm:$0xff] %vm1827_vm1, %v1808_v58  ;;  %v1348_v52 = vmax.f32 %v3199_v0, %v1312_v59 }
 0x14f   :  { %1844 = vst.msk [vmem:[%s3417_s2 + $0x80] sm:$0xff] %vm1827_vm1, %v1807_v7  ;;  %v1347_v53 = vmax.f32 %v3201_v1, %v1311_v40  ;;  %v2444_v4 = vpop.f32.mrb[56].mxu0 }
 0x150   :  { %v2506_v5 = vpop.f32.mrb[56].mxu1  ;;  %v1810_v10 = vmax.f32 %v1348_v52, %v1774_v3  ;;  %v1314_v11 = vmax.f32 %v2444_v4, 0.0  ;;  %v1214_v14 = vpop.f32.mrb[57].mxu0 }
 0x151   :  { %v1776_v15 = vmax.f32 %v2506_v5, 0.0  ;;  %v1676_v18 = vpop.f32.mrb[57].mxu1  ;;  %v1809_v19 = vmax.f32 %v1347_v53, %v1773_v41  ;;  %v1313_v16 = vmax.f32 %v1214_v14, 0.0 }
 0x152   :  { %v1775_v17 = vmax.f32 %v1676_v18, 0.0  ;;  %1847 = vst.msk [vmem:[%s3417_s2 + $0x98] sm:$0xff] %vm1827_vm1, %v1810_v10  ;;  %v1350_v0 = vmax.f32 %v3203_v12, %v1314_v11 }
 0x153   :  { %1846 = vst.msk [vmem:[%s3417_s2 + $0x90] sm:$0xff] %vm1827_vm1, %v1809_v19  ;;  %v1349_v1 = vmax.f32 %v3205_v13, %v1313_v16  ;;  %v2447_v20 = vpop.f32.mrb[58].mxu0 }
 0x154   :  { %v2509_v21 = vpop.f32.mrb[58].mxu1  ;;  %v1812_v50 = vmax.f32 %v1350_v0, %v1776_v15  ;;  %v1316_v51 = vmax.f32 %v2447_v20, 0.0  ;;  %v1224_v28 = vpop.f32.mrb[59].mxu0 }
 0x155   :  { %v1778_v29 = vmax.f32 %v2509_v21, 0.0  ;;  %v1686_v32 = vpop.f32.mrb[59].mxu1  ;;  %v1811_v33 = vmax.f32 %v1349_v1, %v1775_v17  ;;  %v1315_v34 = vmax.f32 %v1224_v28, 0.0 }
 0x156   :  { %v1777_v35 = vmax.f32 %v1686_v32, 0.0  ;;  %1849 = vst.msk [vmem:[%s3417_s2 + $0xa8] sm:$0xff] %vm1827_vm1, %v1812_v50  ;;  %v1352_v12 = vmax.f32 %v3207_v24, %v1316_v51 }
 0x157   :  { %1848 = vst.msk [vmem:[%s3417_s2 + $0xa0] sm:$0xff] %vm1827_vm1, %v1811_v33  ;;  %v1351_v13 = vmax.f32 %v3209_v25, %v1315_v34  ;;  %v2450_v26 = vpop.f32.mrb[60].mxu0 }
 0x158   :  { %v2512_v27 = vpop.f32.mrb[60].mxu1  ;;  %v1814_v36 = vmax.f32 %v1352_v12, %v1778_v29  ;;  %v1318_v37 = vmax.f32 %v2450_v26, 0.0  ;;  %v1234_v30 = vpop.f32.mrb[61].mxu0 }
 0x159   :  { %v1780_v31 = vmax.f32 %v2512_v27, 0.0  ;;  %v1696_v60 = vpop.f32.mrb[61].mxu1  ;;  %v1813_v61 = vmax.f32 %v1351_v13, %v1777_v35  ;;  %v1317_v46 = vmax.f32 %v1234_v30, 0.0 }
 0x15a   :  { %v1779_v47 = vmax.f32 %v1696_v60, 0.0  ;;  %1851 = vst.msk [vmem:[%s3417_s2 + $0xb8] sm:$0xff] %vm1827_vm1, %v1814_v36  ;;  %v1354_v24 = vmax.f32 %v3211_v42, %v1318_v37 }
 0x15b   :  { %1850 = vst.msk [vmem:[%s3417_s2 + $0xb0] sm:$0xff] %vm1827_vm1, %v1813_v61  ;;  %v1353_v25 = vmax.f32 %v3213_v43, %v1317_v46  ;;  %v2453_v48 = vpop.f32.mrb[62].mxu0 }
 0x15c   :  { %v2515_v49 = vpop.f32.mrb[62].mxu1  ;;  %v1816_v38 = vmax.f32 %v1354_v24, %v1780_v31  ;;  %v1320_v39 = vmax.f32 %v2453_v48, 0.0  ;;  %v1244_v54 = vpop.f32.mrb[63].mxu0 }
 0x15d   :  { %v1782_v55 = vmax.f32 %v2515_v49, 0.0  ;;  %v1706_v58 = vpop.f32.mrb[63].mxu1  ;;  %v1815_v59 = vmax.f32 %v1353_v25, %v1779_v47  ;;  %v1319_v2 = vmax.f32 %v1244_v54, 0.0 }
 0x15e   :  { %v1781_v3 = vmax.f32 %v1706_v58, 0.0  ;;  %1853 = vst.msk [vmem:[%s3417_s2 + $0xc8] sm:$0xff] %vm1827_vm1, %v1816_v38  ;;  %v1356_v42 = vmax.f32 %v3215_v56, %v1320_v39 }
 0x15f   :  { %1852 = vst.msk [vmem:[%s3417_s2 + $0xc0] sm:$0xff] %vm1827_vm1, %v1815_v59  ;;  %v1355_v43 = vmax.f32 %v3217_v57, %v1319_v2  ;;  %v2456_v6 = vpop.f32.mrb[64].mxu0 }
 0x160   :  { %v2518_v7 = vpop.f32.mrb[64].mxu1  ;;  %v1818_v40 = vmax.f32 %v1356_v42, %v1782_v55  ;;  %v1322_v41 = vmax.f32 %v2456_v6, 0.0  ;;  %v1254_v52 = vpop.f32.mrb[65].mxu0 }
 0x161   :  { %v1784_v53 = vmax.f32 %v2518_v7, 0.0  ;;  %v1716_v4 = vpop.f32.mrb[65].mxu1  ;;  %v1817_v5 = vmax.f32 %v1355_v43, %v1781_v3  ;;  %v1321_v10 = vmax.f32 %v1254_v52, 0.0 }
 0x162   :  { %v1783_v11 = vmax.f32 %v1716_v4, 0.0  ;;  %1855 = vst.msk [vmem:[%s3417_s2 + $0xd8] sm:$0xff] %vm1827_vm1, %v1818_v40  ;;  %v1358_v56 = vmax.f32 %v3219_v8, %v1322_v41 }
 0x163   :  { %1854 = vst.msk [vmem:[%s3417_s2 + $0xd0] sm:$0xff] %vm1827_vm1, %v1817_v5  ;;  %v1357_v57 = vmax.f32 %v3221_v9, %v1321_v10  ;;  %v2459_v14 = vpop.f32.mrb[66].mxu0 }
 0x164   :  { %v2521_v15 = vpop.f32.mrb[66].mxu1  ;;  %v1820_v18 = vmax.f32 %v1358_v56, %v1784_v53  ;;  %v1324_v19 = vmax.f32 %v2459_v14, 0.0  ;;  %v1264_v16 = vpop.f32.mrb[67].mxu0 }
 0x165   :  { %v1786_v17 = vmax.f32 %v2521_v15, 0.0  ;;  %v1726_v0 = vpop.f32.mrb[67].mxu1  ;;  %v1819_v1 = vmax.f32 %v1357_v57, %v1783_v11  ;;  %v1323_v20 = vmax.f32 %v1264_v16, 0.0 }
 0x166   :  { %v1785_v21 = vmax.f32 %v1726_v0, 0.0  ;;  %1857 = vst.msk [vmem:[%s3417_s2 + $0xe8] sm:$0xff] %vm1827_vm1, %v1820_v18  ;;  %v1360_v8 = vmax.f32 %v3223_v22, %v1324_v19 }
 0x167   :  { %1856 = vst.msk [vmem:[%s3417_s2 + $0xe0] sm:$0xff] %vm1827_vm1, %v1819_v1  ;;  %v1359_v9 = vmax.f32 %v3225_v23, %v1323_v20  ;;  %v2462_v50 = vpop.f32.mrb[68].mxu0 }
 0x168   :  { %v2524_v51 = vpop.f32.mrb[68].mxu1  ;;  %v1822_v28 = vmax.f32 %v1360_v8, %v1786_v17  ;;  %v1326_v29 = vmax.f32 %v2462_v50, 0.0  ;;  %v1274_v32 = vpop.f32.mrb[69].mxu0 }
 0x169   :  { %v1788_v33 = vmax.f32 %v2524_v51, 0.0  ;;  %v1736_v34 = vpop.f32.mrb[69].mxu1  ;;  %v1821_v35 = vmax.f32 %v1359_v9, %v1785_v21  ;;  %v1325_v12 = vmax.f32 %v1274_v32, 0.0 }
 0x16a   :  { %v1787_v13 = vmax.f32 %v1736_v34, 0.0  ;;  %1859 = vst.msk [vmem:[%s3417_s2 + $0xf8] sm:$0xff] %vm1827_vm1, %v1822_v28  ;;  %v1362_v22 = vmax.f32 %v3227_v44, %v1326_v29 }
 0x16b   :  { %1858 = vst.msk [vmem:[%s3417_s2 + $0xf0] sm:$0xff] %vm1827_vm1, %v1821_v35  ;;  %v1361_v23 = vmax.f32 %v3229_v45, %v1325_v12  ;;  %v2465_v26 = vpop.f32.mrb[70].mxu0 }
 0x16c   :  { %v2527_v27 = vpop.f32.mrb[70].mxu1  ;;  %v1824_v36 = vmax.f32 %v1362_v22, %v1788_v33  ;;  %v1328_v37 = vmax.f32 %v2465_v26, 0.0  ;;  %v1284_v30 = vpop.f32.mrb[71].mxu0 }
 0x16d   :  { %v1790_v31 = vmax.f32 %v2527_v27, 0.0  ;;  %v1746_v60 = vpop.f32.mrb[71].mxu1  ;;  %v1823_v61 = vmax.f32 %v1361_v23, %v1787_v13  ;;  %v1327_v46 = vmax.f32 %v1284_v30, 0.0 }
 0x16e   :  { %v1789_v47 = vmax.f32 %v1746_v60, 0.0  ;;  %1861 = vst.msk [vmem:[%s3417_s2 + $0x108] sm:$0xff] %vm1827_vm1, %v1824_v36  ;;  %v1364_v44 = vmax.f32 %v3231_v62, %v1328_v37 }
 0x16f   :  { %1860 = vst.msk [vmem:[%s3417_s2 + $0x100] sm:$0xff] %vm1827_vm1, %v1823_v61  ;;  %v1363_v45 = vmax.f32 %v3233_v63, %v1327_v46 }
 0x170   :  { %v1826_v24 = vmax.f32 %v1364_v44, %v1790_v31 }
 0x171   :  { %v1825_v25 = vmax.f32 %v1363_v45, %v1789_v47 }
 0x172   :  { %1863 = vst.msk [vmem:[%s3417_s2 + $0x118] sm:$0xff] %vm1827_vm1, %v1826_v24 }
 0x173   :  { %1862 = vst.msk [vmem:[%s3417_s2 + $0x110] sm:$0xff] %vm1827_vm1, %v1825_v25 }

// kernel: net_mnist_forward.4
= control target key start
LH: loop header
LB: loop body
LE: loop exit
PB: predicated region body
PF: predicated region fallthrough
CT: control target
= control target key end

     0   :  { %vm850_vm0 = vcmask 408576   ;;  %s2122_s1 = inlined_call_operand.vmem [shape: f32[512,50], index: 1, kind: input, shape index: {}]   ;;  %s2123_s0 = inlined_call_operand.vmem [shape: f32[4,32,512], index: 0, kind: input, shape index: {}]   ;;  %s2124_s2 = inlined_call_operand.vmem [shape: f32[32,50], index: 2, kind: output, shape index: {}]  }
   0x1   :  { %v27_v0 = vld [vmem:[%s2122_s1 + $0x80] sm:$0xff]  ;;  %v28_v1 = vld [vmem:[%s2122_s1 + $0x88] sm:$0xff]  ;;  %v29_v11 = vld [vmem:[%s2122_s1 + $0x90] sm:$0xff] }
   0x2   :  { %v59_v2 = vld [vmem:[%s2122_s1 + $0x180] sm:$0xff]  ;;  %v1539_v3 = vpack.c.bf16 %v28_v1, %v27_v0  ;;  %v60_v4 = vld [vmem:[%s2122_s1 + $0x188] sm:$0xff]  ;;  %v30_v13 = vld [vmem:[%s2122_s1 + $0x98] sm:$0xff] }
   0x3   :  { %v11_v5 = vld [vmem:[%s2122_s1] sm:$0xff]  ;;  %v12_v6 = vld [vmem:[%s2122_s1 + $0x8] sm:$0xff]  ;;  %v1550_v7 = vpack.c.bf16 %v60_v4, %v59_v2  ;;  %v61_v14 = vld [vmem:[%s2122_s1 + $0x190] sm:$0xff]  ;;  %v1577_v16 = vpack.c.bf16 %v30_v13, %v29_v11 }
   0x4   :  { %v1552_v8 = vpack.c.bf16 %v12_v6, %v11_v5  ;;  %v43_v9 = vld [vmem:[%s2122_s1 + $0x100] sm:$0xff]  ;;  %v44_v10 = vld [vmem:[%s2122_s1 + $0x108] sm:$0xff]  ;;  %1260 = vmatprep.subr.bf16.mxu0 %v1539_v3  ;;  %v62_v15 = vld [vmem:[%s2122_s1 + $0x198] sm:$0xff] }
   0x5   :  { %v1564_v12 = vpack.c.bf16 %v44_v10, %v43_v9  ;;  %1292 = vmatprep.subr.bf16.mxu1 %v1550_v7  ;;  %v1579_v17 = vpack.c.bf16 %v62_v15, %v61_v14  ;;  %v13_v18 = vld [vmem:[%s2122_s1 + $0x10] sm:$0xff]  ;;  %v14_v19 = vld [vmem:[%s2122_s1 + $0x18] sm:$0xff]  ;;  %v31_v23 = vld [vmem:[%s2122_s1 + $0xa0] sm:$0xff] }
   0x6   :  { %1262 = vmatpush3.bf16.msra.mxu0 %v1552_v8  ;;  %v45_v20 = vld [vmem:[%s2122_s1 + $0x110] sm:$0xff]  ;;  %v1591_v21 = vpack.c.bf16 %v14_v19, %v13_v18  ;;  %v46_v22 = vld [vmem:[%s2122_s1 + $0x118] sm:$0xff]  ;;  %v32_v24 = vld [vmem:[%s2122_s1 + $0xa8] sm:$0xff] }
   0x7   :  { %1294 = vmatpush3.bf16.msra.mxu1 %v1564_v12  ;;  %1264 = vmatprep.subr.bf16.mxu0 %v1577_v16  ;;  %v1604_v25 = vpack.c.bf16 %v46_v22, %v45_v20  ;;  %v1606_v26 = vpack.c.bf16 %v32_v24, %v31_v23  ;;  %v63_v27 = vld [vmem:[%s2122_s1 + $0x1a0] sm:$0xff]  ;;  %v64_v28 = vld [vmem:[%s2122_s1 + $0x1a8] sm:$0xff]  ;;  %v33_v35 = vld [vmem:[%s2122_s1 + $0xb0] sm:$0xff] }
   0x8   :  { %1296 = vmatprep.subr.bf16.mxu1 %v1579_v17  ;;  %v15_v29 = vld [vmem:[%s2122_s1 + $0x20] sm:$0xff]  ;;  %v1617_v30 = vpack.c.bf16 %v64_v28, %v63_v27  ;;  %v16_v31 = vld [vmem:[%s2122_s1 + $0x28] sm:$0xff]  ;;  %v34_v36 = vld [vmem:[%s2122_s1 + $0xb8] sm:$0xff] }
   0x9   :  { %v47_v32 = vld [vmem:[%s2122_s1 + $0x120] sm:$0xff]  ;;  %v48_v33 = vld [vmem:[%s2122_s1 + $0x128] sm:$0xff]  ;;  %v1629_v34 = vpack.c.bf16 %v16_v31, %v15_v29  ;;  %v65_v37 = vld [vmem:[%s2122_s1 + $0x1b0] sm:$0xff]  ;;  %v1644_v39 = vpack.c.bf16 %v34_v36, %v33_v35 }
   0xa   :  { %1266 = vmatpush3.bf16.msra.mxu0 %v1591_v21  ;;  %v1642_v38 = vpack.c.bf16 %v48_v33, %v47_v32  ;;  %v66_v40 = vld [vmem:[%s2122_s1 + $0x1b8] sm:$0xff]  ;;  %v17_v41 = vld [vmem:[%s2122_s1 + $0x30] sm:$0xff]  ;;  %v35_v46 = vld [vmem:[%s2122_s1 + $0xc0] sm:$0xff] }
   0xb   :  { %1298 = vmatpush3.bf16.msra.mxu1 %v1604_v25  ;;  %1268 = vmatprep.subr.bf16.mxu0 %v1606_v26  ;;  %v18_v42 = vld [vmem:[%s2122_s1 + $0x38] sm:$0xff]  ;;  %v1656_v43 = vpack.c.bf16 %v66_v40, %v65_v37  ;;  %v49_v44 = vld [vmem:[%s2122_s1 + $0x130] sm:$0xff]  ;;  %v36_v47 = vld [vmem:[%s2122_s1 + $0xc8] sm:$0xff] }
   0xc   :  { %1300 = vmatprep.subr.bf16.mxu1 %v1617_v30  ;;  %v50_v45 = vld [vmem:[%s2122_s1 + $0x138] sm:$0xff]  ;;  %v67_v48 = vld [vmem:[%s2122_s1 + $0x1c0] sm:$0xff]  ;;  %v68_v49 = vld [vmem:[%s2122_s1 + $0x1c8] sm:$0xff]  ;;  %v1677_v50 = vpack.c.bf16 %v18_v42, %v17_v41  ;;  %v1683_v52 = vpack.c.bf16 %v36_v47, %v35_v46 }
   0xd   :  { %v1681_v51 = vpack.c.bf16 %v50_v45, %v49_v44  ;;  %v19_v53 = vld [vmem:[%s2122_s1 + $0x40] sm:$0xff]  ;;  %v20_v54 = vld [vmem:[%s2122_s1 + $0x48] sm:$0xff]  ;;  %v1695_v56 = vpack.c.bf16 %v68_v49, %v67_v48  ;;  %v37_v58 = vld [vmem:[%s2122_s1 + $0xd0] sm:$0xff] }
   0xe   :  { %1270 = vmatpush3.bf16.msra.mxu0 %v1629_v34  ;;  %v51_v55 = vld [vmem:[%s2122_s1 + $0x140] sm:$0xff]  ;;  %v52_v57 = vld [vmem:[%s2122_s1 + $0x148] sm:$0xff]  ;;  %v38_v59 = vld [vmem:[%s2122_s1 + $0xd8] sm:$0xff]  ;;  %v1713_v62 = vpack.c.bf16 %v20_v54, %v19_v53 }
   0xf   :  { %1302 = vmatpush3.bf16.msra.mxu1 %v1642_v38  ;;  %1272 = vmatprep.subr.bf16.mxu0 %v1644_v39  ;;  %v69_v60 = vld [vmem:[%s2122_s1 + $0x1d0] sm:$0xff]  ;;  %v70_v61 = vld [vmem:[%s2122_s1 + $0x1d8] sm:$0xff]  ;;  %v1717_v63 = vpack.c.bf16 %v52_v57, %v51_v55  ;;  %v1719_v0 = vpack.c.bf16 %v38_v59, %v37_v58  ;;  %v39_v9 = vld [vmem:[%s2122_s1 + $0xe0] sm:$0xff] }
  0x10   :  { %1304 = vmatprep.subr.bf16.mxu1 %v1656_v43  ;;  %v21_v1 = vld [vmem:[%s2122_s1 + $0x50] sm:$0xff]  ;;  %v22_v2 = vld [vmem:[%s2122_s1 + $0x58] sm:$0xff]  ;;  %v1731_v5 = vpack.c.bf16 %v70_v61, %v69_v60  ;;  %v40_v10 = vld [vmem:[%s2122_s1 + $0xe8] sm:$0xff] }
  0x11   :  { %v53_v4 = vld [vmem:[%s2122_s1 + $0x150] sm:$0xff]  ;;  %v54_v6 = vld [vmem:[%s2122_s1 + $0x158] sm:$0xff]  ;;  %v71_v11 = vld [vmem:[%s2122_s1 + $0x1e0] sm:$0xff]  ;;  %v1749_v14 = vpack.c.bf16 %v22_v2, %v21_v1  ;;  %v1761_v20 = vpack.c.bf16 %v40_v10, %v39_v9 }
  0x12   :  { %1274 = vmatpush3.bf16.msra.mxu0 %v1677_v50  ;;  %v72_v13 = vld [vmem:[%s2122_s1 + $0x1e8] sm:$0xff]  ;;  %v23_v15 = vld [vmem:[%s2122_s1 + $0x60] sm:$0xff]  ;;  %v1759_v19 = vpack.c.bf16 %v54_v6, %v53_v4  ;;  %v78_v24 = vld [vmem:[%s2123_s0 + $0x18] sm:$0xff] }
  0x13   :  { %1306 = vmatpush3.bf16.msra.mxu1 %v1681_v51  ;;  %1276 = vmatprep.subr.bf16.mxu0 %v1683_v52  ;;  %v24_v18 = vld [vmem:[%s2122_s1 + $0x68] sm:$0xff]  ;;  %v55_v22 = vld [vmem:[%s2122_s1 + $0x160] sm:$0xff]  ;;  %v1773_v27 = vpack.c.bf16 %v72_v13, %v71_v11  ;;  %v41_v29 = vld [vmem:[%s2122_s1 + $0xf0] sm:$0xff] }
  0x14   :  { %1308 = vmatprep.subr.bf16.mxu1 %v1695_v56  ;;  %v76_v23 = vld [vmem:[%s2123_s0 + $0x8] sm:$0xff]  ;;  %v42_v31 = vld [vmem:[%s2122_s1 + $0xf8] sm:$0xff]  ;;  %v73_v32 = vld [vmem:[%s2122_s1 + $0x1f0] sm:$0xff]  ;;  %240 = vmatprep.mubr.f32.mxu1 %v78_v24  ;;  %v1791_v35 = vpack.c.bf16 %v24_v18, %v23_v15 }
  0x15   :  { %v56_v28 = vld [vmem:[%s2122_s1 + $0x168] sm:$0xff]  ;;  %155 = vmatprep.mubr.f32.mxu0 %v76_v23  ;;  %v74_v33 = vld [vmem:[%s2122_s1 + $0x1f8] sm:$0xff]  ;;  %v1797_v37 = vpack.c.bf16 %v42_v31, %v41_v29  ;;  %v25_v40 = vld [vmem:[%s2122_s1 + $0x70] sm:$0xff] }
  0x16   :  { %1278 = vmatpush3.bf16.msra.mxu0 %v1713_v62  ;;  %v1795_v36 = vpack.c.bf16 %v56_v28, %v55_v22  ;;  %v26_v41 = vld [vmem:[%s2122_s1 + $0x78] sm:$0xff]  ;;  %v1806_v42 = vpack.c.bf16 %v74_v33, %v73_v32  ;;  %v57_v44 = vld [vmem:[%s2122_s1 + $0x170] sm:$0xff]  ;;  %v75_v48 = vld [vmem:[%s2123_s0] sm:$0xff] }
  0x17   :  { %1310 = vmatpush3.bf16.msra.mxu1 %v1717_v63  ;;  %1280 = vmatprep.subr.bf16.mxu0 %v1719_v0  ;;  %v58_v45 = vld [vmem:[%s2122_s1 + $0x178] sm:$0xff]  ;;  %v1815_v46 = vpack.c.bf16 %v26_v41, %v25_v40  ;;  %v77_v49 = vld [vmem:[%s2123_s0 + $0x10] sm:$0xff]  ;;  %v80_v53 = vld [vmem:[%s2123_s0 + $0x28] sm:$0xff] }
  0x18   :  { %1312 = vmatprep.subr.bf16.mxu1 %v1731_v5  ;;  %v1819_v47 = vpack.c.bf16 %v58_v45, %v57_v44  ;;  %v82_v54 = vld [vmem:[%s2123_s0 + $0x38] sm:$0xff]  ;;  %v79_v55 = vld [vmem:[%s2123_s0 + $0x20] sm:$0xff]  ;;  %v81_v57 = vld [vmem:[%s2123_s0 + $0x30] sm:$0xff] }
  0x19   :  { %v84_v58 = vld [vmem:[%s2123_s0 + $0x48] sm:$0xff]  ;;  %v86_v59 = vld [vmem:[%s2123_s0 + $0x58] sm:$0xff]  ;;  %v83_v60 = vld [vmem:[%s2123_s0 + $0x40] sm:$0xff] }
  0x1a   :  { %1282 = vmatpush3.bf16.msra.mxu0 %v1749_v14  ;;  %v85_v61 = vld [vmem:[%s2123_s0 + $0x50] sm:$0xff]  ;;  %v88_v1 = vld [vmem:[%s2123_s0 + $0x68] sm:$0xff]  ;;  %v90_v2 = vld [vmem:[%s2123_s0 + $0x78] sm:$0xff] }
  0x1b   :  { %1314 = vmatpush3.bf16.msra.mxu1 %v1759_v19  ;;  %1284 = vmatprep.subr.bf16.mxu0 %v1761_v20  ;;  %v87_v4 = vld [vmem:[%s2123_s0 + $0x60] sm:$0xff]  ;;  %v89_v6 = vld [vmem:[%s2123_s0 + $0x70] sm:$0xff]  ;;  %v860_v9 = vld [vmem:[%s2123_s0 + $0x88] sm:$0xff] }
  0x1c   :  { %1316 = vmatprep.subr.bf16.mxu1 %v1773_v27  ;;  %v862_v10 = vld [vmem:[%s2123_s0 + $0x98] sm:$0xff]  ;;  %v859_v11 = vld [vmem:[%s2123_s0 + $0x80] sm:$0xff]  ;;  %v861_v13 = vld [vmem:[%s2123_s0 + $0x90] sm:$0xff] }
  0x1d   :  { %v864_v15 = vld [vmem:[%s2123_s0 + $0xa8] sm:$0xff]  ;;  %v866_v18 = vld [vmem:[%s2123_s0 + $0xb8] sm:$0xff]  ;;  %v863_v22 = vld [vmem:[%s2123_s0 + $0xa0] sm:$0xff] }
  0x1e   :  { %1286 = vmatpush3.bf16.msra.mxu0 %v1791_v35  ;;  %v865_v23 = vld [vmem:[%s2123_s0 + $0xb0] sm:$0xff]  ;;  %v868_v24 = vld [vmem:[%s2123_s0 + $0xc8] sm:$0xff]  ;;  %v870_v28 = vld [vmem:[%s2123_s0 + $0xd8] sm:$0xff] }
  0x1f   :  { %1318 = vmatpush3.bf16.msra.mxu1 %v1795_v36  ;;  %1288 = vmatprep.subr.bf16.mxu0 %v1797_v37  ;;  %v867_v29 = vld [vmem:[%s2123_s0 + $0xc0] sm:$0xff]  ;;  %v869_v31 = vld [vmem:[%s2123_s0 + $0xd0] sm:$0xff]  ;;  %v872_v32 = vld [vmem:[%s2123_s0 + $0xe8] sm:$0xff] }
  0x20   :  { %1320 = vmatprep.subr.bf16.mxu1 %v1806_v42  ;;  %v874_v33 = vld [vmem:[%s2123_s0 + $0xf8] sm:$0xff]  ;;  %v871_v40 = vld [vmem:[%s2123_s0 + $0xe0] sm:$0xff]  ;;  %v873_v41 = vld [vmem:[%s2123_s0 + $0xf0] sm:$0xff] }
  0x21   :  { %v876_v44 = vld [vmem:[%s2123_s0 + $0x108] sm:$0xff]  ;;  %v878_v45 = vld [vmem:[%s2123_s0 + $0x118] sm:$0xff] }
  0x22   :  { %1290 = vmatpush3.bf16.msra.mxu0 %v1815_v46 }
  0x23   :  { %1322 = vmatpush3.bf16.msra.mxu1 %v1819_v47  ;;  %1324 = vmatprep.subr.bf16.mxu0 %v1539_v3 }
  0x24   :  { %1356 = vmatprep.subr.bf16.mxu1 %v1550_v7 }
  0x25   :  { %156 = vmatmul.mubr.f32.vlgmr.msra.gmra.mrb[0].mxu0 %v75_v48  ;;  %v875_v48 = vld [vmem:[%s2123_s0 + $0x100] sm:$0xff] }
  0x26   :  { %241 = vmatmul.mubr.f32.vlgmr.msra.gmra.mrb[0].mxu1 %v77_v49  ;;  %1326 = vmatpush3.bf16.msra.mxu0 %v1552_v8  ;;  %v877_v49 = vld [vmem:[%s2123_s0 + $0x110] sm:$0xff] }
  0x27   :  { %1358 = vmatpush3.bf16.msra.mxu1 %v1564_v12  ;;  %1328 = vmatprep.subr.bf16.mxu0 %v1577_v16 }
  0x28   :  { %1360 = vmatprep.subr.bf16.mxu1 %v1579_v17  ;;  %160 = vmatprep.mubr.f32.mxu0 %v80_v53  ;;  %v880_v53 = vld [vmem:[%s2123_s0 + $0x128] sm:$0xff] }
  0x29   :  { %245 = vmatprep.mubr.f32.mxu1 %v82_v54  ;;  %161 = vmatmul.mubr.f32.gmra.mrb[2].mxu0 %v79_v55  ;;  %v882_v54 = vld [vmem:[%s2123_s0 + $0x138] sm:$0xff]  ;;  %v879_v55 = vld [vmem:[%s2123_s0 + $0x120] sm:$0xff] }
  0x2a   :  { %1330 = vmatpush3.bf16.msra.mxu0 %v1591_v21  ;;  %246 = vmatmul.mubr.f32.gmra.mrb[2].mxu1 %v81_v57 }
  0x2b   :  { %1362 = vmatpush3.bf16.msra.mxu1 %v1604_v25  ;;  %1332 = vmatprep.subr.bf16.mxu0 %v1606_v26 }
  0x2c   :  { %1364 = vmatprep.subr.bf16.mxu1 %v1617_v30  ;;  %165 = vmatprep.mubr.f32.mxu0 %v84_v58 }
  0x2d   :  { %250 = vmatprep.mubr.f32.mxu1 %v86_v59  ;;  %166 = vmatmul.mubr.f32.gmra.mrb[4].mxu0 %v83_v60 }
  0x2e   :  { %1334 = vmatpush3.bf16.msra.mxu0 %v1629_v34  ;;  %251 = vmatmul.mubr.f32.gmra.mrb[4].mxu1 %v85_v61 }
  0x2f   :  { %1366 = vmatpush3.bf16.msra.mxu1 %v1642_v38  ;;  %1336 = vmatprep.subr.bf16.mxu0 %v1644_v39 }
  0x30   :  { %1368 = vmatprep.subr.bf16.mxu1 %v1656_v43  ;;  %170 = vmatprep.mubr.f32.mxu0 %v88_v1 }
  0x31   :  { %255 = vmatprep.mubr.f32.mxu1 %v90_v2  ;;  %171 = vmatmul.mubr.f32.gmra.mrb[6].mxu0 %v87_v4 }
  0x32   :  { %1338 = vmatpush3.bf16.msra.mxu0 %v1677_v50  ;;  %256 = vmatmul.mubr.f32.gmra.mrb[6].mxu1 %v89_v6 }
  0x33   :  { %1370 = vmatpush3.bf16.msra.mxu1 %v1681_v51  ;;  %1340 = vmatprep.subr.bf16.mxu0 %v1683_v52 }
  0x34   :  { %1372 = vmatprep.subr.bf16.mxu1 %v1695_v56  ;;  %346 = vmatprep.mubr.f32.mxu0 %v860_v9 }
  0x35   :  { %431 = vmatprep.mubr.f32.mxu1 %v862_v10 }
  0x36   :  { %1342 = vmatpush3.bf16.msra.mxu0 %v1713_v62 }
  0x37   :  { %1374 = vmatpush3.bf16.msra.mxu1 %v1717_v63  ;;  %1344 = vmatprep.subr.bf16.mxu0 %v1719_v0 }
  0x38   :  { %1376 = vmatprep.subr.bf16.mxu1 %v1731_v5 }
  0x3a   :  { %1346 = vmatpush3.bf16.msra.mxu0 %v1749_v14 }
  0x3b   :  { %1378 = vmatpush3.bf16.msra.mxu1 %v1759_v19  ;;  %1348 = vmatprep.subr.bf16.mxu0 %v1761_v20 }
  0x3c   :  { %1380 = vmatprep.subr.bf16.mxu1 %v1773_v27 }
  0x3e   :  { %1350 = vmatpush3.bf16.msra.mxu0 %v1791_v35 }
  0x3f   :  { %1382 = vmatpush3.bf16.msra.mxu1 %v1795_v36  ;;  %1352 = vmatprep.subr.bf16.mxu0 %v1797_v37 }
  0x40   :  { %1384 = vmatprep.subr.bf16.mxu1 %v1806_v42 }
  0x42   :  { %1354 = vmatpush3.bf16.msra.mxu0 %v1815_v46 }
  0x43   :  { %1386 = vmatpush3.bf16.msra.mxu1 %v1819_v47  ;;  %1388 = vmatprep.subr.bf16.mxu0 %v1539_v3 }
  0x44   :  { %1420 = vmatprep.subr.bf16.mxu1 %v1550_v7 }
  0x45   :  { %347 = vmatmul.mubr.f32.vlgmr.msra.gmra.mrb[8].mxu0 %v859_v11 }
  0x46   :  { %432 = vmatmul.mubr.f32.vlgmr.msra.gmra.mrb[8].mxu1 %v861_v13  ;;  %1390 = vmatpush3.bf16.msra.mxu0 %v1552_v8 }
  0x47   :  { %1422 = vmatpush3.bf16.msra.mxu1 %v1564_v12  ;;  %351 = vmatprep.mubr.f32.mxu0 %v864_v15 }
  0x48   :  { %436 = vmatprep.mubr.f32.mxu1 %v866_v18  ;;  %1392 = vmatprep.subr.bf16.mxu0 %v1577_v16 }
  0x49   :  { %352 = vmatmul.mubr.f32.gmra.mrb[10].mxu0 %v863_v22  ;;  %1424 = vmatprep.subr.bf16.mxu1 %v1579_v17 }
  0x4a   :  { %437 = vmatmul.mubr.f32.gmra.mrb[10].mxu1 %v865_v23  ;;  %1394 = vmatpush3.bf16.msra.mxu0 %v1591_v21 }
  0x4b   :  { %1426 = vmatpush3.bf16.msra.mxu1 %v1604_v25  ;;  %356 = vmatprep.mubr.f32.mxu0 %v868_v24 }
  0x4c   :  { %441 = vmatprep.mubr.f32.mxu1 %v870_v28  ;;  %1396 = vmatprep.subr.bf16.mxu0 %v1606_v26 }
  0x4d   :  { %357 = vmatmul.mubr.f32.gmra.mrb[12].mxu0 %v867_v29  ;;  %1428 = vmatprep.subr.bf16.mxu1 %v1617_v30 }
  0x4e   :  { %442 = vmatmul.mubr.f32.gmra.mrb[12].mxu1 %v869_v31  ;;  %1398 = vmatpush3.bf16.msra.mxu0 %v1629_v34 }
  0x4f   :  { %1430 = vmatpush3.bf16.msra.mxu1 %v1642_v38  ;;  %361 = vmatprep.mubr.f32.mxu0 %v872_v32 }
  0x50   :  { %446 = vmatprep.mubr.f32.mxu1 %v874_v33  ;;  %1400 = vmatprep.subr.bf16.mxu0 %v1644_v39 }
  0x51   :  { %362 = vmatmul.mubr.f32.gmra.mrb[14].mxu0 %v871_v40  ;;  %1432 = vmatprep.subr.bf16.mxu1 %v1656_v43 }
  0x52   :  { %447 = vmatmul.mubr.f32.gmra.mrb[14].mxu1 %v873_v41  ;;  %1402 = vmatpush3.bf16.msra.mxu0 %v1677_v50 }
  0x53   :  { %1434 = vmatpush3.bf16.msra.mxu1 %v1681_v51  ;;  %1404 = vmatprep.subr.bf16.mxu0 %v1683_v52 }
  0x54   :  { %1436 = vmatprep.subr.bf16.mxu1 %v1695_v56  ;;  %541 = vmatprep.mubr.f32.mxu0 %v876_v44 }
  0x55   :  { %626 = vmatprep.mubr.f32.mxu1 %v878_v45 }
  0x56   :  { %1406 = vmatpush3.bf16.msra.mxu0 %v1713_v62 }
  0x57   :  { %1438 = vmatpush3.bf16.msra.mxu1 %v1717_v63  ;;  %1408 = vmatprep.subr.bf16.mxu0 %v1719_v0 }
  0x58   :  { %1440 = vmatprep.subr.bf16.mxu1 %v1731_v5 }
  0x5a   :  { %1410 = vmatpush3.bf16.msra.mxu0 %v1749_v14 }
  0x5b   :  { %1442 = vmatpush3.bf16.msra.mxu1 %v1759_v19  ;;  %1412 = vmatprep.subr.bf16.mxu0 %v1761_v20 }
  0x5c   :  { %1444 = vmatprep.subr.bf16.mxu1 %v1773_v27 }
  0x5e   :  { %1414 = vmatpush3.bf16.msra.mxu0 %v1791_v35 }
  0x5f   :  { %1446 = vmatpush3.bf16.msra.mxu1 %v1795_v36  ;;  %1416 = vmatprep.subr.bf16.mxu0 %v1797_v37 }
  0x60   :  { %1448 = vmatprep.subr.bf16.mxu1 %v1806_v42 }
  0x62   :  { %1418 = vmatpush3.bf16.msra.mxu0 %v1815_v46 }
  0x63   :  { %1450 = vmatpush3.bf16.msra.mxu1 %v1819_v47  ;;  %1452 = vmatprep.subr.bf16.mxu0 %v1539_v3  ;;  %v881_v3 = vld [vmem:[%s2123_s0 + $0x130] sm:$0xff] }
  0x64   :  { %1484 = vmatprep.subr.bf16.mxu1 %v1550_v7  ;;  %v884_v7 = vld [vmem:[%s2123_s0 + $0x148] sm:$0xff] }
  0x65   :  { %542 = vmatmul.mubr.f32.vlgmr.msra.gmra.mrb[16].mxu0 %v875_v48 }
  0x66   :  { %627 = vmatmul.mubr.f32.vlgmr.msra.gmra.mrb[16].mxu1 %v877_v49  ;;  %1454 = vmatpush3.bf16.msra.mxu0 %v1552_v8  ;;  %v886_v8 = vld [vmem:[%s2123_s0 + $0x158] sm:$0xff] }
  0x67   :  { %1486 = vmatpush3.bf16.msra.mxu1 %v1564_v12  ;;  %546 = vmatprep.mubr.f32.mxu0 %v880_v53  ;;  %v883_v12 = vld [vmem:[%s2123_s0 + $0x140] sm:$0xff] }
  0x68   :  { %631 = vmatprep.mubr.f32.mxu1 %v882_v54  ;;  %1456 = vmatprep.subr.bf16.mxu0 %v1577_v16  ;;  %v885_v16 = vld [vmem:[%s2123_s0 + $0x150] sm:$0xff] }
  0x69   :  { %547 = vmatmul.mubr.f32.gmra.mrb[18].mxu0 %v879_v55  ;;  %1488 = vmatprep.subr.bf16.mxu1 %v1579_v17  ;;  %v888_v17 = vld [vmem:[%s2123_s0 + $0x168] sm:$0xff] }
  0x6a   :  { %632 = vmatmul.mubr.f32.gmra.mrb[18].mxu1 %v881_v3  ;;  %1458 = vmatpush3.bf16.msra.mxu0 %v1591_v21  ;;  %v890_v21 = vld [vmem:[%s2123_s0 + $0x178] sm:$0xff] }
  0x6b   :  { %1490 = vmatpush3.bf16.msra.mxu1 %v1604_v25  ;;  %551 = vmatprep.mubr.f32.mxu0 %v884_v7  ;;  %v887_v25 = vld [vmem:[%s2123_s0 + $0x160] sm:$0xff] }
  0x6c   :  { %636 = vmatprep.mubr.f32.mxu1 %v886_v8  ;;  %1460 = vmatprep.subr.bf16.mxu0 %v1606_v26  ;;  %v889_v26 = vld [vmem:[%s2123_s0 + $0x170] sm:$0xff] }
  0x6d   :  { %552 = vmatmul.mubr.f32.gmra.mrb[20].mxu0 %v883_v12  ;;  %1492 = vmatprep.subr.bf16.mxu1 %v1617_v30  ;;  %v892_v30 = vld [vmem:[%s2123_s0 + $0x188] sm:$0xff] }
  0x6e   :  { %637 = vmatmul.mubr.f32.gmra.mrb[20].mxu1 %v885_v16  ;;  %1462 = vmatpush3.bf16.msra.mxu0 %v1629_v34  ;;  %v894_v34 = vld [vmem:[%s2123_s0 + $0x198] sm:$0xff] }
  0x6f   :  { %1494 = vmatpush3.bf16.msra.mxu1 %v1642_v38  ;;  %556 = vmatprep.mubr.f32.mxu0 %v888_v17  ;;  %v891_v38 = vld [vmem:[%s2123_s0 + $0x180] sm:$0xff] }
  0x70   :  { %641 = vmatprep.mubr.f32.mxu1 %v890_v21  ;;  %1464 = vmatprep.subr.bf16.mxu0 %v1644_v39  ;;  %v893_v39 = vld [vmem:[%s2123_s0 + $0x190] sm:$0xff] }
  0x71   :  { %557 = vmatmul.mubr.f32.gmra.mrb[22].mxu0 %v887_v25  ;;  %1496 = vmatprep.subr.bf16.mxu1 %v1656_v43  ;;  %v896_v43 = vld [vmem:[%s2123_s0 + $0x1a8] sm:$0xff] }
  0x72   :  { %642 = vmatmul.mubr.f32.gmra.mrb[22].mxu1 %v889_v26  ;;  %1466 = vmatpush3.bf16.msra.mxu0 %v1677_v50  ;;  %v898_v50 = vld [vmem:[%s2123_s0 + $0x1b8] sm:$0xff] }
  0x73   :  { %1498 = vmatpush3.bf16.msra.mxu1 %v1681_v51  ;;  %1468 = vmatprep.subr.bf16.mxu0 %v1683_v52  ;;  %v895_v51 = vld [vmem:[%s2123_s0 + $0x1a0] sm:$0xff]  ;;  %v897_v52 = vld [vmem:[%s2123_s0 + $0x1b0] sm:$0xff] }
  0x74   :  { %1500 = vmatprep.subr.bf16.mxu1 %v1695_v56  ;;  %736 = vmatprep.mubr.f32.mxu0 %v892_v30  ;;  %v900_v56 = vld [vmem:[%s2123_s0 + $0x1c8] sm:$0xff] }
  0x75   :  { %821 = vmatprep.mubr.f32.mxu1 %v894_v34 }
  0x76   :  { %1470 = vmatpush3.bf16.msra.mxu0 %v1713_v62  ;;  %v902_v62 = vld [vmem:[%s2123_s0 + $0x1d8] sm:$0xff] }
  0x77   :  { %1502 = vmatpush3.bf16.msra.mxu1 %v1717_v63  ;;  %1472 = vmatprep.subr.bf16.mxu0 %v1719_v0  ;;  %v899_v63 = vld [vmem:[%s2123_s0 + $0x1c0] sm:$0xff]  ;;  %v901_v0 = vld [vmem:[%s2123_s0 + $0x1d0] sm:$0xff] }
  0x78   :  { %1504 = vmatprep.subr.bf16.mxu1 %v1731_v5  ;;  %v904_v5 = vld [vmem:[%s2123_s0 + $0x1e8] sm:$0xff] }
  0x7a   :  { %1474 = vmatpush3.bf16.msra.mxu0 %v1749_v14  ;;  %v906_v14 = vld [vmem:[%s2123_s0 + $0x1f8] sm:$0xff] }
  0x7b   :  { %1506 = vmatpush3.bf16.msra.mxu1 %v1759_v19  ;;  %1476 = vmatprep.subr.bf16.mxu0 %v1761_v20  ;;  %v903_v19 = vld [vmem:[%s2123_s0 + $0x1e0] sm:$0xff]  ;;  %v905_v20 = vld [vmem:[%s2123_s0 + $0x1f0] sm:$0xff] }
  0x7c   :  { %1508 = vmatprep.subr.bf16.mxu1 %v1773_v27 }
  0x7e   :  { %1478 = vmatpush3.bf16.msra.mxu0 %v1791_v35 }
  0x7f   :  { %1510 = vmatpush3.bf16.msra.mxu1 %v1795_v36  ;;  %1480 = vmatprep.subr.bf16.mxu0 %v1797_v37 }
  0x80   :  { %1512 = vmatprep.subr.bf16.mxu1 %v1806_v42 }
  0x82   :  { %1482 = vmatpush3.bf16.msra.mxu0 %v1815_v46 }
  0x83   :  { %1514 = vmatpush3.bf16.msra.mxu1 %v1819_v47 }
  0x85   :  { %737 = vmatmul.mubr.f32.vlgmr.msra.gmra.mrb[24].mxu0 %v891_v38 }
  0x86   :  { %822 = vmatmul.mubr.f32.vlgmr.msra.gmra.mrb[24].mxu1 %v893_v39  ;;  %741 = vmatprep.mubr.f32.mxu0 %v896_v43 }
  0x87   :  { %826 = vmatprep.mubr.f32.mxu1 %v898_v50 }
  0x89   :  { %742 = vmatmul.mubr.f32.gmra.mrb[26].mxu0 %v895_v51 }
  0x8a   :  { %827 = vmatmul.mubr.f32.gmra.mrb[26].mxu1 %v897_v52  ;;  %746 = vmatprep.mubr.f32.mxu0 %v900_v56 }
  0x8b   :  { %831 = vmatprep.mubr.f32.mxu1 %v902_v62 }
  0x8d   :  { %747 = vmatmul.mubr.f32.gmra.mrb[28].mxu0 %v899_v63 }
  0x8e   :  { %832 = vmatmul.mubr.f32.gmra.mrb[28].mxu1 %v901_v0  ;;  %751 = vmatprep.mubr.f32.mxu0 %v904_v5 }
  0x8f   :  { %836 = vmatprep.mubr.f32.mxu1 %v906_v14 }
  0x91   :  { %752 = vmatmul.mubr.f32.gmra.mrb[30].mxu0 %v903_v19 }
  0x92   :  { %837 = vmatmul.mubr.f32.gmra.mrb[30].mxu1 %v905_v20 }
  0xf8   :  { %v939_v27 = vpop.f32.mrb[0].mxu0 }
  0xf9   :  { %v983_v35 = vpop.f32.mrb[0].mxu1  ;;  %v940_v36 = vpop.f32.mrb[1].mxu0 }
  0xfa   :  { %v941_v37 = vadd.f32 %v940_v36, %v939_v27  ;;  %v984_v42 = vpop.f32.mrb[1].mxu1 }
  0xfb   :  { %v985_v46 = vadd.f32 %v984_v42, %v983_v35 }
  0xfc   :  { %v942_v47 = vpop.f32.mrb[2].mxu0 }
  0xfd   :  { %v243_v57 = vadd.f32 %v985_v46, %v941_v37  ;;  %v986_v58 = vpop.f32.mrb[2].mxu1  ;;  %v943_v59 = vpop.f32.mrb[3].mxu0 }
  0xfe   :  { %v944_v60 = vadd.f32 %v943_v59, %v942_v47  ;;  %v987_v61 = vpop.f32.mrb[3].mxu1 }
  0xff   :  { %v988_v1 = vadd.f32 %v987_v61, %v986_v58  ;;  %v261_v7 = vmax.f32 %v243_v57, 0.0 }
 0x100   :  { %v945_v2 = vpop.f32.mrb[4].mxu0 }
 0x101   :  { %v248_v4 = vadd.f32 %v988_v1, %v944_v60  ;;  %v989_v6 = vpop.f32.mrb[4].mxu1  ;;  %v946_v9 = vpop.f32.mrb[5].mxu0 }
 0x102   :  { %v947_v10 = vadd.f32 %v946_v9, %v945_v2  ;;  %v990_v11 = vpop.f32.mrb[5].mxu1 }
 0x103   :  { %v991_v13 = vadd.f32 %v990_v11, %v989_v6  ;;  %v262_v38 = vmax.f32 %v248_v4, 0.0 }
 0x104   :  { %v948_v15 = vpop.f32.mrb[6].mxu0 }
 0x105   :  { %v253_v18 = vadd.f32 %v991_v13, %v947_v10  ;;  %v992_v22 = vpop.f32.mrb[6].mxu1  ;;  %v949_v23 = vpop.f32.mrb[7].mxu0 }
 0x106   :  { %v950_v24 = vadd.f32 %v949_v23, %v948_v15  ;;  %v993_v28 = vpop.f32.mrb[7].mxu1 }
 0x107   :  { %v994_v29 = vadd.f32 %v993_v28, %v992_v22  ;;  %v263_v5 = vmax.f32 %v253_v18, 0.0 }
 0x109   :  { %v258_v31 = vadd.f32 %v994_v29, %v950_v24 }
 0x10b   :  { %v264_v35 = vmax.f32 %v258_v31, 0.0 }
 0x118   :  { %v1027_v32 = vpop.f32.mrb[8].mxu0 }
 0x119   :  { %v1071_v33 = vpop.f32.mrb[8].mxu1  ;;  %v1028_v40 = vpop.f32.mrb[9].mxu0 }
 0x11a   :  { %v1029_v41 = vadd.f32 %v1028_v40, %v1027_v32  ;;  %v1072_v44 = vpop.f32.mrb[9].mxu1 }
 0x11b   :  { %v1073_v45 = vadd.f32 %v1072_v44, %v1071_v33 }
 0x11c   :  { %v1030_v48 = vpop.f32.mrb[10].mxu0 }
 0x11d   :  { %v434_v49 = vadd.f32 %v1073_v45, %v1029_v41  ;;  %v1074_v53 = vpop.f32.mrb[10].mxu1  ;;  %v1031_v54 = vpop.f32.mrb[11].mxu0 }
 0x11e   :  { %v1032_v55 = vadd.f32 %v1031_v54, %v1030_v48  ;;  %v1075_v3 = vpop.f32.mrb[11].mxu1 }
 0x11f   :  { %v452_v8 = vmax.f32 %v434_v49, 0.0  ;;  %v1076_v12 = vadd.f32 %v1075_v3, %v1074_v53 }
 0x120   :  { %v1033_v16 = vpop.f32.mrb[12].mxu0 }
 0x121   :  { %v456_v17 = vmax.f32 %v261_v7, %v452_v8  ;;  %v439_v21 = vadd.f32 %v1076_v12, %v1032_v55  ;;  %v1077_v25 = vpop.f32.mrb[12].mxu1  ;;  %v1034_v26 = vpop.f32.mrb[13].mxu0 }
 0x122   :  { %v1035_v30 = vadd.f32 %v1034_v26, %v1033_v16  ;;  %v1078_v34 = vpop.f32.mrb[13].mxu1 }
 0x123   :  { %v453_v39 = vmax.f32 %v439_v21, 0.0  ;;  %v1079_v43 = vadd.f32 %v1078_v34, %v1077_v25 }
 0x124   :  { %v1036_v50 = vpop.f32.mrb[14].mxu0 }
 0x125   :  { %v457_v51 = vmax.f32 %v262_v38, %v453_v39  ;;  %v444_v52 = vadd.f32 %v1079_v43, %v1035_v30  ;;  %v1080_v56 = vpop.f32.mrb[14].mxu1  ;;  %v1037_v62 = vpop.f32.mrb[15].mxu0 }
 0x126   :  { %v1038_v63 = vadd.f32 %v1037_v62, %v1036_v50  ;;  %v1081_v0 = vpop.f32.mrb[15].mxu1 }
 0x127   :  { %v454_v14 = vmax.f32 %v444_v52, 0.0  ;;  %v1082_v19 = vadd.f32 %v1081_v0, %v1080_v56 }
 0x129   :  { %v458_v20 = vmax.f32 %v263_v5, %v454_v14  ;;  %v449_v27 = vadd.f32 %v1082_v19, %v1038_v63 }
 0x12b   :  { %v455_v36 = vmax.f32 %v449_v27, 0.0 }
 0x12d   :  { %v459_v37 = vmax.f32 %v264_v35, %v455_v36 }
 0x138   :  { %v1115_v42 = vpop.f32.mrb[16].mxu0 }
 0x139   :  { %v1159_v46 = vpop.f32.mrb[16].mxu1  ;;  %v1116_v47 = vpop.f32.mrb[17].mxu0 }
 0x13a   :  { %v1117_v57 = vadd.f32 %v1116_v47, %v1115_v42  ;;  %v1160_v58 = vpop.f32.mrb[17].mxu1 }
 0x13b   :  { %v1161_v59 = vadd.f32 %v1160_v58, %v1159_v46 }
 0x13c   :  { %v1118_v60 = vpop.f32.mrb[18].mxu0 }
 0x13d   :  { %v629_v61 = vadd.f32 %v1161_v59, %v1117_v57  ;;  %v1162_v1 = vpop.f32.mrb[18].mxu1  ;;  %v1119_v2 = vpop.f32.mrb[19].mxu0 }
 0x13e   :  { %v1120_v4 = vadd.f32 %v1119_v2, %v1118_v60  ;;  %v1163_v6 = vpop.f32.mrb[19].mxu1 }
 0x13f   :  { %v647_v9 = vmax.f32 %v629_v61, 0.0  ;;  %v1164_v10 = vadd.f32 %v1163_v6, %v1162_v1 }
 0x140   :  { %v1121_v11 = vpop.f32.mrb[20].mxu0 }
 0x141   :  { %v651_v13 = vmax.f32 %v456_v17, %v647_v9  ;;  %v634_v15 = vadd.f32 %v1164_v10, %v1120_v4  ;;  %v1165_v18 = vpop.f32.mrb[20].mxu1  ;;  %v1122_v22 = vpop.f32.mrb[21].mxu0 }
 0x142   :  { %v1123_v23 = vadd.f32 %v1122_v22, %v1121_v11  ;;  %v1166_v24 = vpop.f32.mrb[21].mxu1 }
 0x143   :  { %v648_v28 = vmax.f32 %v634_v15, 0.0  ;;  %v1167_v29 = vadd.f32 %v1166_v24, %v1165_v18 }
 0x144   :  { %v1124_v31 = vpop.f32.mrb[22].mxu0 }
 0x145   :  { %v652_v32 = vmax.f32 %v457_v51, %v648_v28  ;;  %v639_v33 = vadd.f32 %v1167_v29, %v1123_v23  ;;  %v1168_v40 = vpop.f32.mrb[22].mxu1  ;;  %v1125_v41 = vpop.f32.mrb[23].mxu0 }
 0x146   :  { %v1126_v44 = vadd.f32 %v1125_v41, %v1124_v31  ;;  %v1169_v45 = vpop.f32.mrb[23].mxu1 }
 0x147   :  { %v649_v48 = vmax.f32 %v639_v33, 0.0  ;;  %v1170_v49 = vadd.f32 %v1169_v45, %v1168_v40 }
 0x149   :  { %v653_v53 = vmax.f32 %v458_v20, %v649_v48  ;;  %v644_v54 = vadd.f32 %v1170_v49, %v1126_v44 }
 0x14b   :  { %v650_v55 = vmax.f32 %v644_v54, 0.0 }
 0x14d   :  { %v654_v3 = vmax.f32 %v459_v37, %v650_v55 }
 0x158   :  { %v1203_v7 = vpop.f32.mrb[24].mxu0 }
 0x159   :  { %v1247_v8 = vpop.f32.mrb[24].mxu1  ;;  %v1204_v12 = vpop.f32.mrb[25].mxu0 }
 0x15a   :  { %v1205_v16 = vadd.f32 %v1204_v12, %v1203_v7  ;;  %v1248_v17 = vpop.f32.mrb[25].mxu1 }
 0x15b   :  { %v1249_v21 = vadd.f32 %v1248_v17, %v1247_v8 }
 0x15c   :  { %v1206_v25 = vpop.f32.mrb[26].mxu0 }
 0x15d   :  { %v824_v26 = vadd.f32 %v1249_v21, %v1205_v16  ;;  %v1250_v30 = vpop.f32.mrb[26].mxu1  ;;  %v1207_v34 = vpop.f32.mrb[27].mxu0 }
 0x15e   :  { %v1208_v38 = vadd.f32 %v1207_v34, %v1206_v25  ;;  %v1251_v39 = vpop.f32.mrb[27].mxu1 }
 0x15f   :  { %v842_v43 = vmax.f32 %v824_v26, 0.0  ;;  %v1252_v50 = vadd.f32 %v1251_v39, %v1250_v30 }
 0x160   :  { %v1209_v51 = vpop.f32.mrb[28].mxu0 }
 0x161   :  { %v846_v52 = vmax.f32 %v651_v13, %v842_v43  ;;  %v829_v56 = vadd.f32 %v1252_v50, %v1208_v38  ;;  %v1253_v62 = vpop.f32.mrb[28].mxu1  ;;  %v1210_v63 = vpop.f32.mrb[29].mxu0 }
 0x162   :  { %v1211_v0 = vadd.f32 %v1210_v63, %v1209_v51  ;;  %v1254_v5 = vpop.f32.mrb[29].mxu1 }
 0x163   :  { %851 = vst.msk [vmem:[%s2124_s2] sm:$0xff] %vm850_vm0, %v846_v52  ;;  %v843_v14 = vmax.f32 %v829_v56, 0.0  ;;  %v1255_v19 = vadd.f32 %v1254_v5, %v1253_v62 }
 0x164   :  { %v1212_v20 = vpop.f32.mrb[30].mxu0 }
 0x165   :  { %v847_v27 = vmax.f32 %v652_v32, %v843_v14  ;;  %v834_v35 = vadd.f32 %v1255_v19, %v1211_v0  ;;  %v1256_v36 = vpop.f32.mrb[30].mxu1  ;;  %v1213_v37 = vpop.f32.mrb[31].mxu0 }
 0x166   :  { %v1214_v42 = vadd.f32 %v1213_v37, %v1212_v20  ;;  %v1257_v46 = vpop.f32.mrb[31].mxu1 }
 0x167   :  { %852 = vst.msk [vmem:[%s2124_s2 + $0x8] sm:$0xff] %vm850_vm0, %v847_v27  ;;  %v844_v47 = vmax.f32 %v834_v35, 0.0  ;;  %v1258_v57 = vadd.f32 %v1257_v46, %v1256_v36 }
 0x169   :  { %v848_v58 = vmax.f32 %v653_v53, %v844_v47  ;;  %v839_v59 = vadd.f32 %v1258_v57, %v1214_v42 }
 0x16b   :  { %853 = vst.msk [vmem:[%s2124_s2 + $0x10] sm:$0xff] %vm850_vm0, %v848_v58  ;;  %v845_v60 = vmax.f32 %v839_v59, 0.0 }
 0x16d   :  { %v849_v61 = vmax.f32 %v654_v3, %v845_v60 }
 0x16f   :  { %854 = vst.msk [vmem:[%s2124_s2 + $0x18] sm:$0xff] %vm850_vm0, %v849_v61 }

// kernel: net_mnist_forward.5
= control target key start
LH: loop header
LB: loop body
LE: loop exit
PB: predicated region body
PF: predicated region fallthrough
CT: control target
= control target key end

     0   :  { %10 = vsyncpa [#allocation3], 0  ;;  %v929_v47 = vmov 1983009808   ;;  %v127_v49 = vlaneseq  ;;  %s1367_s0 = inlined_call_operand.vmem [shape: f32[2,808], index: 0, kind: input, shape index: {}]   ;;  %s1368_s1 = inlined_call_operand.vmem [shape: f32[808,128], index: 1, kind: input, shape index: {}]   ;;  %s1369_s2 = inlined_call_operand.vmem [shape: f32[129,128], index: 2, kind: input, shape index: {}]   ;;  %s1370_s3 = inlined_call_operand.hbm [shape: f32[2,128], index: 3, kind: output, shape index: {0}]   ;;  %s1371_s4 = inlined_call_operand.hbm [shape: f32[2,128], index: 4, kind: output, shape index: {1}]  }
   0x1   :  { %v36_v0 = vld [vmem:[%s1368_s1 + $0x80] sm:$0xff]  ;;  %v37_v1 = vld [vmem:[%s1368_s1 + $0x88] sm:$0xff]  ;;  %v38_v11 = vld [vmem:[%s1368_s1 + $0x90] sm:$0xff]  ;;  %v125_v48 = vunpack.c.l.s4 %v929_v47 }
   0x2   :  { %v68_v2 = vld [vmem:[%s1368_s1 + $0x180] sm:$0xff]  ;;  %v745_v3 = vpack.c.bf16 %v37_v1, %v36_v0  ;;  %v69_v4 = vld [vmem:[%s1368_s1 + $0x188] sm:$0xff]  ;;  %v39_v13 = vld [vmem:[%s1368_s1 + $0x98] sm:$0xff]  ;;  %v128_v0 = vshrl.u32 %v127_v49, 7 }
   0x3   :  { %v20_v5 = vld [vmem:[%s1368_s1] sm:$0xff]  ;;  %v21_v6 = vld [vmem:[%s1368_s1 + $0x8] sm:$0xff]  ;;  %v777_v7 = vpack.c.bf16 %v69_v4, %v68_v2  ;;  %v70_v14 = vld [vmem:[%s1368_s1 + $0x190] sm:$0xff]  ;;  %v749_v16 = vpack.c.bf16 %v39_v13, %v38_v11  ;;  %v126_v63 = vunpack.c.0.s8 %v125_v48 }
   0x4   :  { %v747_v8 = vpack.c.bf16 %v21_v6, %v20_v5  ;;  %v52_v9 = vld [vmem:[%s1368_s1 + $0x100] sm:$0xff]  ;;  %v53_v10 = vld [vmem:[%s1368_s1 + $0x108] sm:$0xff]  ;;  %746 = vmatprep.subr.bf16.mxu0 %v745_v3  ;;  %v71_v15 = vld [vmem:[%s1368_s1 + $0x198] sm:$0xff] }
   0x5   :  { %v779_v12 = vpack.c.bf16 %v53_v10, %v52_v9  ;;  %778 = vmatprep.subr.bf16.mxu1 %v777_v7  ;;  %v781_v17 = vpack.c.bf16 %v71_v15, %v70_v14  ;;  %v22_v18 = vld [vmem:[%s1368_s1 + $0x10] sm:$0xff]  ;;  %v23_v19 = vld [vmem:[%s1368_s1 + $0x18] sm:$0xff]  ;;  %v40_v23 = vld [vmem:[%s1368_s1 + $0xa0] sm:$0xff]  ;;  %v1110_v13 = vsub.s32 %v126_v63, %v128_v0 }
   0x6   :  { %748 = vmatpush3.bf16.msra.mxu0 %v747_v8  ;;  %v54_v20 = vld [vmem:[%s1368_s1 + $0x110] sm:$0xff]  ;;  %v751_v21 = vpack.c.bf16 %v23_v19, %v22_v18  ;;  %v55_v22 = vld [vmem:[%s1368_s1 + $0x118] sm:$0xff]  ;;  %v41_v24 = vld [vmem:[%s1368_s1 + $0xa8] sm:$0xff] }
   0x7   :  { %780 = vmatpush3.bf16.msra.mxu1 %v779_v12  ;;  %750 = vmatprep.subr.bf16.mxu0 %v749_v16  ;;  %v783_v25 = vpack.c.bf16 %v55_v22, %v54_v20  ;;  %v753_v26 = vpack.c.bf16 %v41_v24, %v40_v23  ;;  %v72_v27 = vld [vmem:[%s1368_s1 + $0x1a0] sm:$0xff]  ;;  %v73_v28 = vld [vmem:[%s1368_s1 + $0x1a8] sm:$0xff]  ;;  %v42_v35 = vld [vmem:[%s1368_s1 + $0xb0] sm:$0xff] }
   0x8   :  { %782 = vmatprep.subr.bf16.mxu1 %v781_v17  ;;  %v24_v29 = vld [vmem:[%s1368_s1 + $0x20] sm:$0xff]  ;;  %v785_v30 = vpack.c.bf16 %v73_v28, %v72_v27  ;;  %v25_v31 = vld [vmem:[%s1368_s1 + $0x28] sm:$0xff]  ;;  %v43_v36 = vld [vmem:[%s1368_s1 + $0xb8] sm:$0xff] }
   0x9   :  { %v56_v32 = vld [vmem:[%s1368_s1 + $0x120] sm:$0xff]  ;;  %v57_v33 = vld [vmem:[%s1368_s1 + $0x128] sm:$0xff]  ;;  %v755_v34 = vpack.c.bf16 %v25_v31, %v24_v29  ;;  %v74_v37 = vld [vmem:[%s1368_s1 + $0x1b0] sm:$0xff]  ;;  %v757_v39 = vpack.c.bf16 %v43_v36, %v42_v35 }
   0xa   :  { %752 = vmatpush3.bf16.msra.mxu0 %v751_v21  ;;  %v787_v38 = vpack.c.bf16 %v57_v33, %v56_v32  ;;  %v75_v40 = vld [vmem:[%s1368_s1 + $0x1b8] sm:$0xff]  ;;  %v26_v41 = vld [vmem:[%s1368_s1 + $0x30] sm:$0xff]  ;;  %v44_v46 = vld [vmem:[%s1368_s1 + $0xc0] sm:$0xff] }
   0xb   :  { %784 = vmatpush3.bf16.msra.mxu1 %v783_v25  ;;  %754 = vmatprep.subr.bf16.mxu0 %v753_v26  ;;  %v27_v42 = vld [vmem:[%s1368_s1 + $0x38] sm:$0xff]  ;;  %v789_v43 = vpack.c.bf16 %v75_v40, %v74_v37  ;;  %v58_v44 = vld [vmem:[%s1368_s1 + $0x130] sm:$0xff]  ;;  %v45_v50 = vld [vmem:[%s1368_s1 + $0xc8] sm:$0xff] }
   0xc   :  { %786 = vmatprep.subr.bf16.mxu1 %v785_v30  ;;  %v59_v45 = vld [vmem:[%s1368_s1 + $0x138] sm:$0xff]  ;;  %v76_v51 = vld [vmem:[%s1368_s1 + $0x1c0] sm:$0xff]  ;;  %v77_v52 = vld [vmem:[%s1368_s1 + $0x1c8] sm:$0xff]  ;;  %v759_v53 = vpack.c.bf16 %v27_v42, %v26_v41  ;;  %v761_v55 = vpack.c.bf16 %v45_v50, %v44_v46 }
   0xd   :  { %v791_v54 = vpack.c.bf16 %v59_v45, %v58_v44  ;;  %v28_v56 = vld [vmem:[%s1368_s1 + $0x40] sm:$0xff]  ;;  %v29_v57 = vld [vmem:[%s1368_s1 + $0x48] sm:$0xff]  ;;  %v793_v59 = vpack.c.bf16 %v77_v52, %v76_v51  ;;  %v46_v61 = vld [vmem:[%s1368_s1 + $0xd0] sm:$0xff] }
   0xe   :  { %756 = vmatpush3.bf16.msra.mxu0 %v755_v34  ;;  %v60_v58 = vld [vmem:[%s1368_s1 + $0x140] sm:$0xff]  ;;  %v61_v60 = vld [vmem:[%s1368_s1 + $0x148] sm:$0xff]  ;;  %v47_v62 = vld [vmem:[%s1368_s1 + $0xd8] sm:$0xff]  ;;  %v763_v3 = vpack.c.bf16 %v29_v57, %v28_v56 }
   0xf   :  { %788 = vmatpush3.bf16.msra.mxu1 %v787_v38  ;;  %758 = vmatprep.subr.bf16.mxu0 %v757_v39  ;;  %v78_v1 = vld [vmem:[%s1368_s1 + $0x1d0] sm:$0xff]  ;;  %v79_v2 = vld [vmem:[%s1368_s1 + $0x1d8] sm:$0xff]  ;;  %v795_v4 = vpack.c.bf16 %v61_v60, %v60_v58  ;;  %v765_v5 = vpack.c.bf16 %v47_v62, %v46_v61  ;;  %v48_v11 = vld [vmem:[%s1368_s1 + $0xe0] sm:$0xff]  ;;  %v930_v61 = vmov 0.0|0.0  }
  0x10   :  { %790 = vmatprep.subr.bf16.mxu1 %v789_v43  ;;  %v30_v6 = vld [vmem:[%s1368_s1 + $0x50] sm:$0xff]  ;;  %v31_v7 = vld [vmem:[%s1368_s1 + $0x58] sm:$0xff]  ;;  %v797_v9 = vpack.c.bf16 %v79_v2, %v78_v1  ;;  %v49_v12 = vld [vmem:[%s1368_s1 + $0xe8] sm:$0xff] }
  0x11   :  { %v62_v8 = vld [vmem:[%s1368_s1 + $0x150] sm:$0xff]  ;;  %v63_v10 = vld [vmem:[%s1368_s1 + $0x158] sm:$0xff]  ;;  %v80_v14 = vld [vmem:[%s1368_s1 + $0x1e0] sm:$0xff]  ;;  %v767_v16 = vpack.c.bf16 %v31_v7, %v30_v6  ;;  %v769_v19 = vpack.c.bf16 %v49_v12, %v48_v11 }
  0x12   :  { %760 = vmatpush3.bf16.msra.mxu0 %v759_v53  ;;  %v81_v15 = vld [vmem:[%s1368_s1 + $0x1e8] sm:$0xff]  ;;  %v32_v17 = vld [vmem:[%s1368_s1 + $0x60] sm:$0xff]  ;;  %v799_v18 = vpack.c.bf16 %v63_v10, %v62_v8  ;;  %v50_v25 = vld [vmem:[%s1368_s1 + $0xf0] sm:$0xff] }
  0x13   :  { %792 = vmatpush3.bf16.msra.mxu1 %v791_v54  ;;  %762 = vmatprep.subr.bf16.mxu0 %v761_v55  ;;  %v33_v20 = vld [vmem:[%s1368_s1 + $0x68] sm:$0xff]  ;;  %v64_v21 = vld [vmem:[%s1368_s1 + $0x160] sm:$0xff]  ;;  %v801_v23 = vpack.c.bf16 %v81_v15, %v80_v14  ;;  %v51_v26 = vld [vmem:[%s1368_s1 + $0xf8] sm:$0xff] }
  0x14   :  { %794 = vmatprep.subr.bf16.mxu1 %v793_v59  ;;  %v18_v22 = vld [vmem:[%s1367_s0] sm:$0xff]  ;;  %v65_v24 = vld [vmem:[%s1368_s1 + $0x168] sm:$0xff]  ;;  %v82_v29 = vld [vmem:[%s1368_s1 + $0x1f0] sm:$0xff]  ;;  %v771_v31 = vpack.c.bf16 %v33_v20, %v32_v17  ;;  %v773_v35 = vpack.c.bf16 %v51_v26, %v50_v25 }
  0x15   :  { %v130_v27 = vrot.slane %v18_v22, %v1110_v13  ;;  %v123_v28 = vcombine.high %v18_v22, %v18_v22  ;;  %v83_v30 = vld [vmem:[%s1368_s1 + $0x1f8] sm:$0xff]  ;;  %v803_v34 = vpack.c.bf16 %v65_v24, %v64_v21  ;;  %v34_v36 = vld [vmem:[%s1368_s1 + $0x70] sm:$0xff]  ;;  %v100_v42 = vld [vmem:[%s1368_s1 + $0x280] sm:$0xff] }
  0x16   :  { %764 = vmatpush3.bf16.msra.mxu0 %v763_v3  ;;  %v35_v37 = vld [vmem:[%s1368_s1 + $0x78] sm:$0xff]  ;;  %v66_v38 = vld [vmem:[%s1368_s1 + $0x170] sm:$0xff]  ;;  %v805_v39 = vpack.c.bf16 %v83_v30, %v82_v29  ;;  %v101_v43 = vld [vmem:[%s1368_s1 + $0x288] sm:$0xff] }
  0x17   :  { %796 = vmatpush3.bf16.msra.mxu1 %v795_v4  ;;  %766 = vmatprep.subr.bf16.mxu0 %v765_v5  ;;  %v138_v32 = vcombine.high %v130_v27, %v130_v27  ;;  %v137_v33 = vrot.slane %v123_v28, %v1110_v13  ;;  %v67_v40 = vld [vmem:[%s1368_s1 + $0x178] sm:$0xff]  ;;  %v775_v44 = vpack.c.bf16 %v35_v37, %v34_v36  ;;  %v84_v47 = vld [vmem:[%s1368_s1 + $0x200] sm:$0xff]  ;;  %v85_v48 = vld [vmem:[%s1368_s1 + $0x208] sm:$0xff] }
  0x18   :  { %798 = vmatprep.subr.bf16.mxu1 %v797_v9  ;;  %v807_v45 = vpack.c.bf16 %v67_v40, %v66_v38  ;;  %v809_v46 = vpack.c.bf16 %v101_v43, %v100_v42  ;;  %v102_v49 = vld [vmem:[%s1368_s1 + $0x290] sm:$0xff]  ;;  %v103_v50 = vld [vmem:[%s1368_s1 + $0x298] sm:$0xff]  ;;  %v116_v51 = vld [vmem:[%s1368_s1 + $0x300] sm:$0xff]  ;;  %v811_v53 = vpack.c.bf16 %v85_v48, %v84_v47 }
  0x19   :  { %229 = vmatprep.mubr.f32.mxu0 %v138_v32  ;;  %v139_v41 = vcombine.high %v137_v33, %v137_v33  ;;  %v117_v52 = vld [vmem:[%s1368_s1 + $0x308] sm:$0xff]  ;;  %v86_v54 = vld [vmem:[%s1368_s1 + $0x210] sm:$0xff]  ;;  %v87_v55 = vld [vmem:[%s1368_s1 + $0x218] sm:$0xff]  ;;  %v813_v56 = vpack.c.bf16 %v103_v50, %v102_v49 }
  0x1a   :  { %768 = vmatpush3.bf16.msra.mxu0 %v767_v16  ;;  %v104_v57 = vld [vmem:[%s1368_s1 + $0x2a0] sm:$0xff]  ;;  %v105_v58 = vld [vmem:[%s1368_s1 + $0x2a8] sm:$0xff]  ;;  %v842_v59 = vpack.c.bf16 %v117_v52, %v116_v51  ;;  %v118_v63 = vld [vmem:[%s1368_s1 + $0x310] sm:$0xff] }
  0x1b   :  { %800 = vmatpush3.bf16.msra.mxu1 %v799_v18  ;;  %770 = vmatprep.subr.bf16.mxu0 %v769_v19  ;;  %v19_v60 = vld [vmem:[%s1367_s0 + $0x8] sm:$0x3f]  ;;  %v119_v0 = vld [vmem:[%s1368_s1 + $0x318] sm:$0xff] }
  0x1c   :  { %802 = vmatprep.subr.bf16.mxu1 %v801_v23  ;;  %299 = vmatprep.mubr.f32.mxu1 %v139_v41  ;;  %v1200_v62 = vrot.slane %v19_v60, %v1110_v13 }
  0x1e   :  { %772 = vmatpush3.bf16.msra.mxu0 %v771_v31 }
  0x1f   :  { %804 = vmatpush3.bf16.msra.mxu1 %v803_v34  ;;  %774 = vmatprep.subr.bf16.mxu0 %v773_v35 }
  0x20   :  { %806 = vmatprep.subr.bf16.mxu1 %v805_v39 }
  0x22   :  { %776 = vmatpush3.bf16.msra.mxu0 %v775_v44 }
  0x23   :  { %808 = vmatpush3.bf16.msra.mxu1 %v807_v45  ;;  %810 = vmatprep.subr.bf16.mxu0 %v809_v46 }
  0x24   :  { %841 = vmatprep.subr.bf16.mxu1 %v930_v61 }
  0x25   :  { %11 = vsyncpa [#allocation5], 0  ;;  %230 = vmatmul.mubr.f32.vlgmr.msra.gmra.mrb[0].mxu0 %v130_v27  ;;  %v815_v1 = vpack.c.bf16 %v87_v55, %v86_v54  ;;  %v155_v2 = vcombine.high %v1200_v62, %v1200_v62  ;;  %v817_v3 = vpack.c.bf16 %v105_v58, %v104_v57  ;;  %v88_v4 = vld [vmem:[%s1368_s1 + $0x220] sm:$0xff]  ;;  %v89_v5 = vld [vmem:[%s1368_s1 + $0x228] sm:$0xff]  ;;  %v845_v6 = vpack.c.bf16 %v119_v0, %v118_v63  ;;  %s933_s15 = smov [#allocation4]  }
  0x26   :  { %300 = vmatmul.mubr.f32.vlgmr.msra.gmra.mrb[0].mxu1 %v137_v33  ;;  %812 = vmatpush3.bf16.msra.mxu0 %v811_v53  ;;  %v106_v7 = vld [vmem:[%s1368_s1 + $0x2b0] sm:$0xff]  ;;  %v107_v8 = vld [vmem:[%s1368_s1 + $0x2b8] sm:$0xff]  ;;  %v140_v9 = vcombine.high %v19_v60, %v19_v60  ;;  %vm931_vm0 = vmmov 0   ;;  %v932_v10 = vmov 0.0   ;;  %v819_v11 = vpack.c.bf16 %v89_v5, %v88_v4  ;;  %v108_v16 = vld [vmem:[%s1368_s1 + $0x2c0] sm:$0xff]  ;;  %s555_s16 = sshll.u32 %s933_s15, 4  ;;  %s556_s16 = int_to_ptr.vmem [resolvable:$true] %s555_s16 }
  0x27   :  { %814 = vmatprep.subr.bf16.mxu0 %v813_v56  ;;  %843 = vmatpush3.bf16.msra.mxu1 %v842_v59  ;;  %v821_v12 = vpack.c.bf16 %v107_v8, %v106_v7  ;;  %v90_v14 = vld [vmem:[%s1368_s1 + $0x230] sm:$0xff]  ;;  %v91_v15 = vld [vmem:[%s1368_s1 + $0x238] sm:$0xff]  ;;  %v109_v17 = vld [vmem:[%s1368_s1 + $0x2c8] sm:$0xff]  ;;  %vm162_vm1 = vcmask 326656   ;;  %p886_p1 = scmp.lt.s32.totalorder %s556_s16, %s556_s16 }
  0x28   :  { %844 = vmatprep.subr.bf16.mxu1 %v930_v61  ;;  %369 = vmatprep.mubr.f32.mxu0 %v155_v2  ;;  %v154_v18 = vrot.slane %v140_v9, %v1110_v13  ;;  %v120_v19 = vld [vmem:[%s1368_s1 + $0x320] sm:$0xff]  ;;  %v823_v20 = vpack.c.bf16 %v91_v15, %v90_v14  ;;  %v825_v21 = vpack.c.bf16 %v109_v17, %v108_v16  ;;  %v93_v23 = vld [vmem:[%s1368_s1 + $0x248] sm:$0xff]  ;;  %v110_v13 = vld [vmem:[%s1368_s1 + $0x2d0] sm:$0xff] }
  0x29   :  { %707 = vmatprep.mubr.msk.f32.mxu1 %vm931_vm0, %v932_v10  ;;  %v92_v22 = vld [vmem:[%s1368_s1 + $0x240] sm:$0xff]  ;;  %v111_v24 = vld [vmem:[%s1368_s1 + $0x2d8] sm:$0xff]  ;;  %v94_v27 = vld [vmem:[%s1368_s1 + $0x250] sm:$0xff] }
  0x2a   :  { %816 = vmatpush3.bf16.msra.mxu0 %v815_v1  ;;  %v827_v25 = vpack.c.bf16 %v93_v23, %v92_v22  ;;  %v829_v26 = vpack.c.bf16 %v111_v24, %v110_v13  ;;  %v95_v28 = vld [vmem:[%s1368_s1 + $0x258] sm:$0xff]  ;;  %v112_v29 = vld [vmem:[%s1368_s1 + $0x2e0] sm:$0xff]  ;;  %v113_v30 = vld [vmem:[%s1368_s1 + $0x2e8] sm:$0xff] }
  0x2b   :  { %818 = vmatprep.subr.bf16.mxu0 %v817_v3  ;;  %846 = vmatpush3.bf16.msra.mxu1 %v845_v6  ;;  %v831_v31 = vpack.c.bf16 %v95_v28, %v94_v27  ;;  %v833_v32 = vpack.c.bf16 %v113_v30, %v112_v29  ;;  %v96_v33 = vld [vmem:[%s1368_s1 + $0x260] sm:$0xff]  ;;  %v97_v34 = vld [vmem:[%s1368_s1 + $0x268] sm:$0xff]  ;;  %v114_v35 = vld [vmem:[%s1368_s1 + $0x2f0] sm:$0xff] }
  0x2c   :  { %705 = vmatprep.subr.mxu1 %v932_v10  ;;  %v115_v36 = vld [vmem:[%s1368_s1 + $0x2f8] sm:$0xff]  ;;  %v835_v37 = vpack.c.bf16 %v97_v34, %v96_v33  ;;  %v98_v39 = vld [vmem:[%s1368_s1 + $0x270] sm:$0xff]  ;;  %v447_v42 = vld [vmem:[%s1369_s2] sm:$0xff] }
  0x2d   :  { %v837_v38 = vpack.c.bf16 %v115_v36, %v114_v35  ;;  %v99_v40 = vld [vmem:[%s1368_s1 + $0x278] sm:$0xff]  ;;  %v448_v43 = vld [vmem:[%s1369_s2 + $0x8] sm:$0xff]  ;;  %v449_v44 = vld [vmem:[%s1369_s2 + $0x10] sm:$0xff]  ;;  %s881_s1 = scalar_lea.vmem %s556_s16, 32 }
  0x2e   :  { %820 = vmatpush3.bf16.msra.mxu0 %v819_v11  ;;  %v839_v41 = vpack.c.bf16 %v99_v40, %v98_v39  ;;  %v848_v45 = vpack.c.bf16 %v448_v43, %v447_v42  ;;  %v450_v46 = vld [vmem:[%s1369_s2 + $0x18] sm:$0xff]  ;;  %v451_v48 = vld [vmem:[%s1369_s2 + $0x20] sm:$0xff]  ;;  %v452_v49 = vld [vmem:[%s1369_s2 + $0x28] sm:$0xff]  ;;  %p882_p0 = scmp.ne.s32.totalorder %s556_s16, %s881_s1  ;;  %p887_p2 = scmp.lt.s32.totalorder %s881_s1, %s881_s1 }
  0x2f   :  { %822 = vmatprep.subr.bf16.mxu0 %v821_v12  ;;  %706 = vmatpush3.msra.mxu1 %v120_v19  ;;  %v851_v47 = vpack.c.bf16 %v450_v46, %v449_v44  ;;  %v854_v50 = vpack.c.bf16 %v452_v49, %v451_v48  ;;  %v453_v51 = vld [vmem:[%s1369_s2 + $0x30] sm:$0xff]  ;;  %v454_v52 = vld [vmem:[%s1369_s2 + $0x38] sm:$0xff]  ;;  %v455_v54 = vld [vmem:[%s1369_s2 + $0x40] sm:$0xff] }
  0x30   :  { %708 = vmatmul.mubr.msk.f32.vlgmr.msra.gmra.mrb[2].mxu1 %vm162_vm1, %v154_v18  ;;  %847 = vmatprep.subr.bf16.mxu1 %v930_v61  ;;  %v857_v53 = vpack.c.bf16 %v454_v52, %v453_v51  ;;  %v456_v55 = vld [vmem:[%s1369_s2 + $0x48] sm:$0xff]  ;;  %v457_v57 = vld [vmem:[%s1369_s2 + $0x50] sm:$0xff]  ;;  %v458_v58 = vld [vmem:[%s1369_s2 + $0x58] sm:$0xff]  ;;  %p888_p3 = por %p887_p2, %p886_p1 }
  0x31   :  { %742 = vmatprep.mubr.msk.f32.mxu1 %vm931_vm0, %v932_v10  ;;  %849 = vmatpush3.bf16.msra.mxu1 %v848_v45  ;;  %v860_v56 = vpack.c.bf16 %v456_v55, %v455_v54  ;;  %v863_v59 = vpack.c.bf16 %v458_v58, %v457_v57  ;;  %v459_v60 = vld [vmem:[%s1369_s2 + $0x60] sm:$0xff]  ;;  %v461_v0 = vld [vmem:[%s1369_s2 + $0x70] sm:$0xff]  ;;  %v462_v1 = vld [vmem:[%s1369_s2 + $0x78] sm:$0xff] }
  0x32   :  { %824 = vmatpush3.bf16.msra.mxu0 %v823_v20  ;;  %850 = vmatprep.subr.bf16.mxu1 %v930_v61  ;;  %v869_v2 = vpack.c.bf16 %v462_v1, %v461_v0  ;;  %p889_p4 = pnand %p888_p3, %p882_p0 }
  0x33   :  { %826 = vmatprep.subr.bf16.mxu0 %v825_v21 }
  0x35   :  { %852 = vmatpush3.bf16.msra.mxu1 %v851_v47 }
  0x36   :  { %828 = vmatpush3.bf16.msra.mxu0 %v827_v25  ;;  %853 = vmatprep.subr.bf16.mxu1 %v930_v61 }
  0x37   :  { %830 = vmatprep.subr.bf16.mxu0 %v829_v26 }
  0x39   :  { %855 = vmatpush3.bf16.msra.mxu1 %v854_v50 }
  0x3a   :  { %832 = vmatpush3.bf16.msra.mxu0 %v831_v31  ;;  %856 = vmatprep.subr.bf16.mxu1 %v930_v61 }
  0x3b   :  { %834 = vmatprep.subr.bf16.mxu0 %v833_v32 }
  0x3d   :  { %858 = vmatpush3.bf16.msra.mxu1 %v857_v53 }
  0x3e   :  { %836 = vmatpush3.bf16.msra.mxu0 %v835_v37  ;;  %859 = vmatprep.subr.bf16.mxu1 %v930_v61 }
  0x3f   :  { %838 = vmatprep.subr.bf16.mxu0 %v837_v38 }
  0x41   :  { %861 = vmatpush3.bf16.msra.mxu1 %v860_v56 }
  0x42   :  { %840 = vmatpush3.bf16.msra.mxu0 %v839_v41  ;;  %862 = vmatprep.subr.bf16.mxu1 %v930_v61 }
  0x45   :  { %370 = vmatmul.mubr.f32.vlgmr.msra.gmra.mrb[2].mxu0 %v1200_v62  ;;  %864 = vmatpush3.bf16.msra.mxu1 %v863_v59  ;;  %v460_v62 = vld [vmem:[%s1369_s2 + $0x68] sm:$0xff] }
  0x46   :  { %865 = vmatprep.subr.bf16.mxu1 %v930_v61  ;;  %v866_v63 = vpack.c.bf16 %v460_v62, %v459_v60 }
  0x49   :  { %867 = vmatpush3.bf16.msra.mxu1 %v866_v63 }
  0x4a   :  { %868 = vmatprep.subr.bf16.mxu1 %v930_v61 }
  0x4d   :  { %870 = vmatpush3.bf16.msra.mxu1 %v869_v2 }
  0xf8   :  { %v601_v3 = vpop.f32.mrb[0].mxu0 }
  0xf9   :  { %v636_v4 = vpop.f32.mrb[0].mxu1  ;;  %v602_v5 = vpop.f32.mrb[1].mxu0 }
  0xfa   :  { %v603_v6 = vadd.f32 %v602_v5, %v601_v3  ;;  %v637_v7 = vpop.f32.mrb[1].mxu1 }
  0xfb   :  { %v638_v8 = vadd.f32 %v637_v7, %v636_v4 }
  0xfd   :  { %v302_v9 = vadd.f32 %v638_v8, %v603_v6 }
 0x103   :  { %v441_v10 = vpop.f32.mrb[2].mxu1 }
 0x104   :  { %v709_v11 = vpop.f32.mrb[3].mxu1 }
 0x118   :  { %v671_v61 = vpop.f32.mrb[2].mxu0 }
 0x119   :  { %v672_v12 = vpop.f32.mrb[3].mxu0 }
 0x11a   :  { %v673_v14 = vadd.f32 %v672_v12, %v671_v61 }
 0x11c   :  { %v372_v15 = vadd.f32 %v673_v14, %v302_v9 }
 0x11e   :  { %v442_v16 = vadd.f32 %v441_v10, %v372_v15 }
 0x120   :  { %879 = vtanh.f32 %v442_v16 }
 0x12a   :  { %v880_v17 = vpop.eup %879 }
 0x12b   :  { %446 = vst [vmem:[#allocation4] sm:$0x3] %v880_v17  ;;  %743 = vmatmul.mubr.f32.vlgmr.msra.gmra.mrb[4].mxu1 %v880_v17 }
 0x12c   :  { %892 = shalt.err (!%p889_p4)
}
 0x12d   :  { %s893_s0 = scalar_lea.hbm %s1371_s4, 32 }
 0x12e   :  { %p894_p5 = scmp.ne.s32.totalorder %s1371_s4, %s893_s0  ;;  %p897_p6 = scmp.lt.u32.totalorder %s893_s0, %s1371_s4 }
 0x130   :  { %p899_p7 = pnand %p897_p6, %p894_p5 }
 0x132   :  { %902 = shalt.err (!%p899_p7)
}
 0x133   :  { %558 = dma.vmem_to_hbm [thread:$0]  %s556_s16, 32, %s1371_s4, [#allocation5]   ;;  %v568_v18 = vld [vmem:[%s1369_s2 + $0x80] ss:$0 sm:$0xff] }
 0x134   :  { %s934_s27 = smov [#allocation2]  }
 0x135   :  { %s545_s28 = sshll.u32 %s934_s27, 4  ;;  %s546_s28 = int_to_ptr.vmem [resolvable:$true] %s545_s28 }
 0x136   :  { %s903_s29 = scalar_lea.vmem %s546_s28, 32  ;;  %p908_p9 = scmp.lt.s32.totalorder %s546_s28, %s546_s28 }
 0x137   :  { %p904_p8 = scmp.ne.s32.totalorder %s546_s28, %s903_s29  ;;  %p909_p10 = scmp.lt.s32.totalorder %s903_s29, %s903_s29 }
 0x139   :  { %p910_p11 = por %p909_p10, %p908_p9 }
 0x13b   :  { %p911_p12 = pnand %p910_p11, %p904_p8 }
 0x1fe   :  { %v534_v19 = vpop.f32.mrb[4].mxu1 }
 0x1ff   :  { %v535_v20 = vadd.f32 %v568_v18, %v534_v19  ;;  %v744_v21 = vpop.f32.mrb[5].mxu1 }
 0x201   :  { %538 = vst [vmem:[#allocation2] sm:$0x3] %v535_v20 }
 0x202   :  { %914 = shalt.err (!%p911_p12)
}
 0x203   :  { %s915_s5 = scalar_lea.hbm %s1370_s3, 32 }
 0x204   :  { %p916_p13 = scmp.ne.s32.totalorder %s1370_s3, %s915_s5  ;;  %p919_p0 = scmp.lt.u32.totalorder %s915_s5, %s1370_s3 }
 0x206   :  { %p921_p1 = pnand %p919_p0, %p916_p13 }
 0x208   :  { %924 = shalt.err (!%p921_p1)
}
 0x209   :  { %548 = dma.vmem_to_hbm [thread:$0]  %s546_s28, 32, %s1370_s3, [#allocation3]  }
 0x20a   :  { %925 = dma.done.wait [#allocation3], 32  }
 0x20b   :  { %926 = vsyncadd [#allocation3], 4294967264 }
 0x20c   :  { %927 = dma.done.wait [#allocation5], 32  }
 0x20d   :  { %928 = vsyncadd [#allocation5], 4294967264 }
 0x20e   :  { %565 = vsyncpa [#allocation3], 1 }
 0x20f   :  { %566 = vsyncpa [#allocation5], 1 }

</bundles_post_ra>
